<compile_context>
chip_gen: v5e
topology: v5e:2x2
jax: 0.10.0
libtpu: 0.0.40
codegen_flags: <defaults>
</compile_context>

<pallas_src>
import jax
import jax.numpy as jnp
from jax.experimental import pallas as pl
from jax.experimental.pallas import tpu as pltpu


def relu_conv3x3_kernel(x_ref, w_ref, o_ref, acc_ref):
    # x_ref:   [1, H+2, Wp, Cin]     full zero-padded input, resident in VMEM
    # w_ref:   [3, Cin, 3*Cout]      kw-packed weights (one slice per kh)
    # o_ref:   [1, tile_h, W, Cout]  output row tile
    # acc_ref: VMEM scratch [tile_h*Wp, 3*Cout] f32
    tile_h = o_ref.shape[1]
    W = o_ref.shape[2]
    Cout = o_ref.shape[3]
    Wp = x_ref.shape[2]
    Cin = x_ref.shape[3]

    # First padded row needed by this output tile: output row r of the tile
    # reads padded rows row0 + r .. row0 + r + 2.
    row0 = pl.multiple_of(pl.program_id(0) * tile_h, tile_h)

    # Three contiguous-slab matmuls; the kw taps live in the weight's output
    # columns, so no W shifting is needed on the LHS.
    for kh in range(3):
        slab = x_ref[0, pl.ds(row0 + kh, tile_h), :, :]        # [tile_h, Wp, Cin]
        slab = jnp.maximum(slab, 0.0)                          # fused ReLU
        slab = slab.reshape(tile_h * Wp, Cin)                  # free view (Wp % 8 == 0)
        partial = jnp.dot(slab, w_ref[kh],
                          preferred_element_type=jnp.float32)  # [tile_h*Wp, 3*Cout]
        if kh == 0:
            acc_ref[...] = partial
        else:
            acc_ref[...] += partial

    # Combine the three kw-shifted column groups:
    #   out[h, w, c] = sum_kw acc[h, w + kw, kw*Cout + c]
    acc = acc_ref[...].reshape(tile_h, Wp, 3 * Cout)           # free view (Wp % 8 == 0)
    out = (acc[:, 0:W,     0:Cout]
           + acc[:, 1:W + 1, Cout:2 * Cout]
           + acc[:, 2:W + 2, 2 * Cout:3 * Cout])
    o_ref[...] = out[None].astype(o_ref.dtype)


@jax.jit
def relu_conv2d(x_nchw, w_oihw):
    """ReLU followed by 3x3 / stride 1 / pad 1 conv (bias-free), NCHW in/out."""
    N, Cin, H, W = x_nchw.shape
    Cout = w_oihw.shape[0]
    assert N == 1, "kernel written for the module's batch=1 case"

    tile_h = 14 if H % 14 == 0 else H          # 2 row tiles for H=28 (v7x megacore)
    Wp = -(-(W + 2) // 8) * 8                  # pad W+2 up to a multiple of 8 -> 32
    Hp = H + 2

    # Layout glue (not the hot path): NCHW -> NHWC, zero pad H by 1/1 and W by
    # 1/(Wp-W-1).  The extra right columns are zero and never read back.
    x_nhwc = jnp.transpose(x_nchw, (0, 2, 3, 1))
    x_pad = jnp.pad(x_nhwc, ((0, 0), (1, 1), (1, Wp - W - 1), (0, 0)))

    # OIHW -> [kh, ci, kw, co] -> [3, Cin, 3*Cout]  (kw packed into output dim).
    w_packed = jnp.transpose(w_oihw, (2, 1, 3, 0)).reshape(3, Cin, 3 * Cout)

    out_nhwc = pl.pallas_call(
        relu_conv3x3_kernel,
        out_shape=jax.ShapeDtypeStruct((N, H, W, Cout), x_nchw.dtype),
        grid_spec=pltpu.PrefetchScalarGridSpec(
            num_scalar_prefetch=0,
            grid=(H // tile_h,),
            in_specs=[
                # Full padded input, resident across the (tiny) grid.
                pl.BlockSpec((N, Hp, Wp, Cin), lambda i: (0, 0, 0, 0)),
                # Packed weights, resident.
                pl.BlockSpec((3, Cin, 3 * Cout), lambda i: (0, 0, 0)),
            ],
            out_specs=pl.BlockSpec((N, tile_h, W, Cout), lambda i: (0, i, 0, 0)),
            scratch_shapes=[pltpu.VMEM((tile_h * Wp, 3 * Cout), jnp.float32)],
        ),
        compiler_params=pltpu.CompilerParams(
            dimension_semantics=("parallel",)),   # split across TCs on v7x
    )(x_pad, w_packed)

    return jnp.transpose(out_nhwc, (0, 3, 1, 2))


def reference(x_nchw, w_oihw):
    x = jnp.maximum(x_nchw, 0.0)
    return jax.lax.conv_general_dilated(
        x, w_oihw, window_strides=(1, 1), padding=((1, 1), (1, 1)),
        dimension_numbers=("NCHW", "OIHW", "NCHW"))


if __name__ == "__main__":
    key = jax.random.PRNGKey(0)
    kx, kw = jax.random.split(key)

    # Shapes implied by the module: input [1, 128, 28, 28], weight [32, 128, 3, 3]
    x84 = jax.random.normal(kx, (1, 128, 28, 28), dtype=jnp.float32)
    w = jax.random.normal(kw, (32, 128, 3, 3), dtype=jnp.float32) * 0.05

    out = jax.block_until_ready(relu_conv2d(x84, w))
    ref = jax.block_until_ready(reference(x84, w))

    assert out.shape == (1, 32, 28, 28), out.shape
    assert jnp.allclose(out, ref, atol=1e-3, rtol=1e-3), (
        float(jnp.max(jnp.abs(out - ref))))

    print("KERNEL_OK")
</pallas_src>

<mosaic_0001>
module attributes {stable_mosaic.version = 11 : i64} {
  func.func @relu_conv3x3_kernel(%arg0: i32, %arg1: memref<1x30x32x128xf32, #tpu.memory_space<vmem>>, %arg2: memref<3x128x96xf32, #tpu.memory_space<vmem>>, %arg3: memref<1x14x28x32xf32, #tpu.memory_space<vmem>>, %arg4: memref<448x96xf32, #tpu.memory_space<vmem>>) attributes {dimension_semantics = [#tpu.dimension_semantics<parallel>], iteration_bounds = array<i64: 2>, scalar_prefetch = 0 : i64, scratch_operands = 1 : i64, tpu.core_type = #tpu.core_type<tc>, window_params = [{pipeline_mode = #tpu.pipeline_mode<synchronous>, transform_indices = @transform_0, window_bounds = array<i64: 1, 30, 32, 128>}, {pipeline_mode = #tpu.pipeline_mode<synchronous>, transform_indices = @transform_1, window_bounds = array<i64: 3, 128, 96>}, {transform_indices = @transform_2, window_bounds = array<i64: 1, 14, 28, 32>}]} {
    %c14_i32 = arith.constant 14 : i32
    %0 = arith.muli %arg0, %c14_i32 : i32
    %1 = tpu.assume_multiple %0, 14 : i32
    %c0_i32 = arith.constant 0 : i32
    %2 = arith.addi %1, %c0_i32 : i32
    %c0 = arith.constant 0 : index
    %3 = arith.index_cast %2 : i32 to index
    %c0_0 = arith.constant 0 : index
    %c0_1 = arith.constant 0 : index
    %4 = vector.load %arg1[%c0, %3, %c0_0, %c0_1] : memref<1x30x32x128xf32, #tpu.memory_space<vmem>>, vector<1x14x32x128xf32>
    %5 = vector.shape_cast %4 : vector<1x14x32x128xf32> to vector<14x32x128xf32>
    %cst = arith.constant 0.000000e+00 : f32
    %6 = vector.broadcast %cst : f32 to vector<14x32x128xf32>
    %7 = arith.maximumf %5, %6 : vector<14x32x128xf32>
    %8 = vector.shape_cast %7 : vector<14x32x128xf32> to vector<448x128xf32>
    %c0_2 = arith.constant 0 : index
    %c0_3 = arith.constant 0 : index
    %c0_4 = arith.constant 0 : index
    %9 = vector.load %arg2[%c0_2, %c0_3, %c0_4] : memref<3x128x96xf32, #tpu.memory_space<vmem>>, vector<1x128x96xf32>
    %10 = vector.shape_cast %9 : vector<1x128x96xf32> to vector<128x96xf32>
    %cst_5 = arith.constant dense<0.000000e+00> : vector<448x96xf32>
    %11 = tpu.matmul %8, %10, %cst_5 {dimension_numbers = #tpu.dot_dimension_numbers<[1], [0], [0], [1], [0, 0, 1, 1], [], []>} : vector<448x128xf32>, vector<128x96xf32>, vector<448x96xf32> -> vector<448x96xf32>
    %c0_6 = arith.constant 0 : index
    %c0_7 = arith.constant 0 : index
    %12 = vector.load %arg4[%c0_6, %c0_7] : memref<448x96xf32, #tpu.memory_space<vmem>>, vector<448x96xf32>
    tpu.vector_store %arg4[%c0_6, %c0_7], %11 {strides = array<i32>} : memref<448x96xf32, #tpu.memory_space<vmem>>, vector<448x96xf32>,
    %c1_i32 = arith.constant 1 : i32
    %13 = arith.addi %1, %c1_i32 : i32
    %c0_8 = arith.constant 0 : index
    %14 = arith.index_cast %13 : i32 to index
    %c0_9 = arith.constant 0 : index
    %c0_10 = arith.constant 0 : index
    %15 = vector.load %arg1[%c0_8, %14, %c0_9, %c0_10] : memref<1x30x32x128xf32, #tpu.memory_space<vmem>>, vector<1x14x32x128xf32>
    %16 = vector.shape_cast %15 : vector<1x14x32x128xf32> to vector<14x32x128xf32>
    %cst_11 = arith.constant 0.000000e+00 : f32
    %17 = vector.broadcast %cst_11 : f32 to vector<14x32x128xf32>
    %18 = arith.maximumf %16, %17 : vector<14x32x128xf32>
    %19 = vector.shape_cast %18 : vector<14x32x128xf32> to vector<448x128xf32>
    %c1 = arith.constant 1 : index
    %c0_12 = arith.constant 0 : index
    %c0_13 = arith.constant 0 : index
    %20 = vector.load %arg2[%c1, %c0_12, %c0_13] : memref<3x128x96xf32, #tpu.memory_space<vmem>>, vector<1x128x96xf32>
    %21 = vector.shape_cast %20 : vector<1x128x96xf32> to vector<128x96xf32>
    %cst_14 = arith.constant dense<0.000000e+00> : vector<448x96xf32>
    %22 = tpu.matmul %19, %21, %cst_14 {dimension_numbers = #tpu.dot_dimension_numbers<[1], [0], [0], [1], [0, 0, 1, 1], [], []>} : vector<448x128xf32>, vector<128x96xf32>, vector<448x96xf32> -> vector<448x96xf32>
    %c0_15 = arith.constant 0 : index
    %c0_16 = arith.constant 0 : index
    %23 = vector.load %arg4[%c0_15, %c0_16] : memref<448x96xf32, #tpu.memory_space<vmem>>, vector<448x96xf32>
    %24 = arith.addf %23, %22 : vector<448x96xf32>
    %c0_17 = arith.constant 0 : index
    %c0_18 = arith.constant 0 : index
    %25 = vector.load %arg4[%c0_17, %c0_18] : memref<448x96xf32, #tpu.memory_space<vmem>>, vector<448x96xf32>
    tpu.vector_store %arg4[%c0_17, %c0_18], %24 {strides = array<i32>} : memref<448x96xf32, #tpu.memory_space<vmem>>, vector<448x96xf32>,
    %c2_i32 = arith.constant 2 : i32
    %26 = arith.addi %1, %c2_i32 : i32
    %c0_19 = arith.constant 0 : index
    %27 = arith.index_cast %26 : i32 to index
    %c0_20 = arith.constant 0 : index
    %c0_21 = arith.constant 0 : index
    %28 = vector.load %arg1[%c0_19, %27, %c0_20, %c0_21] : memref<1x30x32x128xf32, #tpu.memory_space<vmem>>, vector<1x14x32x128xf32>
    %29 = vector.shape_cast %28 : vector<1x14x32x128xf32> to vector<14x32x128xf32>
    %cst_22 = arith.constant 0.000000e+00 : f32
    %30 = vector.broadcast %cst_22 : f32 to vector<14x32x128xf32>
    %31 = arith.maximumf %29, %30 : vector<14x32x128xf32>
    %32 = vector.shape_cast %31 : vector<14x32x128xf32> to vector<448x128xf32>
    %c2 = arith.constant 2 : index
    %c0_23 = arith.constant 0 : index
    %c0_24 = arith.constant 0 : index
    %33 = vector.load %arg2[%c2, %c0_23, %c0_24] : memref<3x128x96xf32, #tpu.memory_space<vmem>>, vector<1x128x96xf32>
    %34 = vector.shape_cast %33 : vector<1x128x96xf32> to vector<128x96xf32>
    %cst_25 = arith.constant dense<0.000000e+00> : vector<448x96xf32>
    %35 = tpu.matmul %32, %34, %cst_25 {dimension_numbers = #tpu.dot_dimension_numbers<[1], [0], [0], [1], [0, 0, 1, 1], [], []>} : vector<448x128xf32>, vector<128x96xf32>, vector<448x96xf32> -> vector<448x96xf32>
    %c0_26 = arith.constant 0 : index
    %c0_27 = arith.constant 0 : index
    %36 = vector.load %arg4[%c0_26, %c0_27] : memref<448x96xf32, #tpu.memory_space<vmem>>, vector<448x96xf32>
    %37 = arith.addf %36, %35 : vector<448x96xf32>
    %c0_28 = arith.constant 0 : index
    %c0_29 = arith.constant 0 : index
    %38 = vector.load %arg4[%c0_28, %c0_29] : memref<448x96xf32, #tpu.memory_space<vmem>>, vector<448x96xf32>
    tpu.vector_store %arg4[%c0_28, %c0_29], %37 {strides = array<i32>} : memref<448x96xf32, #tpu.memory_space<vmem>>, vector<448x96xf32>,
    %c0_30 = arith.constant 0 : index
    %c0_31 = arith.constant 0 : index
    %39 = vector.load %arg4[%c0_30, %c0_31] : memref<448x96xf32, #tpu.memory_space<vmem>>, vector<448x96xf32>
    %40 = vector.shape_cast %39 : vector<448x96xf32> to vector<14x32x96xf32>
    %41 = vector.extract_strided_slice %40 {offsets = [0, 0, 0], sizes = [14, 28, 32], strides = [1, 1, 1]} : vector<14x32x96xf32> to vector<14x28x32xf32>
    %42 = vector.extract_strided_slice %40 {offsets = [0, 1, 32], sizes = [14, 28, 32], strides = [1, 1, 1]} : vector<14x32x96xf32> to vector<14x28x32xf32>
    %43 = arith.addf %41, %42 : vector<14x28x32xf32>
    %44 = vector.extract_strided_slice %40 {offsets = [0, 2, 64], sizes = [14, 28, 32], strides = [1, 1, 1]} : vector<14x32x96xf32> to vector<14x28x32xf32>
    %45 = arith.addf %43, %44 : vector<14x28x32xf32>
    %46 = vector.shape_cast %45 : vector<14x28x32xf32> to vector<1x14x28x32xf32>
    %c0_32 = arith.constant 0 : index
    %c0_33 = arith.constant 0 : index
    %c0_34 = arith.constant 0 : index
    %c0_35 = arith.constant 0 : index
    %47 = vector.load %arg3[%c0_32, %c0_33, %c0_34, %c0_35] : memref<1x14x28x32xf32, #tpu.memory_space<vmem>>, vector<1x14x28x32xf32>
    tpu.vector_store %arg3[%c0_32, %c0_33, %c0_34, %c0_35], %46 {strides = array<i32>} : memref<1x14x28x32xf32, #tpu.memory_space<vmem>>, vector<1x14x28x32xf32>,
    return
  }
  func.func @transform_0(%arg0: i32) -> (i32, i32, i32, i32) {
    %c0_i32 = arith.constant 0 : i32
    %c0_i32_0 = arith.constant 0 : i32
    %c0_i32_1 = arith.constant 0 : i32
    %c0_i32_2 = arith.constant 0 : i32
    %c0_i32_3 = arith.constant 0 : i32
    return %c0_i32, %c0_i32_0, %c0_i32_1, %c0_i32_2 : i32, i32, i32, i32
  }
  func.func @transform_1(%arg0: i32) -> (i32, i32, i32) {
    %c0_i32 = arith.constant 0 : i32
    %c0_i32_0 = arith.constant 0 : i32
    %c0_i32_1 = arith.constant 0 : i32
    %c0_i32_2 = arith.constant 0 : i32
    return %c0_i32, %c0_i32_0, %c0_i32_1 : i32, i32, i32
  }
  func.func @transform_2(%arg0: i32) -> (i32, i32, i32, i32) {
    %c0_i32 = arith.constant 0 : i32
    %c0_i32_0 = arith.constant 0 : i32
    %c0_i32_1 = arith.constant 0 : i32
    %c0_i32_2 = arith.constant 0 : i32
    return %c0_i32, %arg0, %c0_i32_0, %c0_i32_1 : i32, i32, i32, i32
  }
}

</mosaic_0001>

<bundles_post_ra>
// kernel: relu_conv2d.1
= control target key start
LH: loop header
LB: loop body
LE: loop exit
PB: predicated region body
PF: predicated region fallthrough
CT: control target
= control target key end

     0   :  { %s2581_s9 = smov 0   ;;  %s4060_s0 = inlined_call_operand.vmem [shape: f32[1,30,32,128], index: 0, kind: input, shape index: {}]   ;;  %s4061_s1 = inlined_call_operand.vmem [shape: f32[3,128,96], index: 1, kind: input, shape index: {}]   ;;  %s4062_s2 = inlined_call_operand.vmem [shape: f32[1,28,28,32], index: 2, kind: output, shape index: {}]  }
   0x1 LB: > { %s2342_s10 = sadd.s32 4294967295, %s2562_s9   ;;  %p2345_p0 = scmp.ge.s32.totalorder %s2562_s9, 1  ;;  %s2562_s9 = sphi %s2581_s9, %s12_s9  }
   0x2   : > { %p102_p1 = scmp.lt.s32.totalorder %s2562_s9, 3 }
   0x4   : > { %p103_p2 = pnand %p2345_p0, %p102_p1 }
   0x5   : > { %s2348_s17 = smul.u32 (!%p103_p2), 448, %s2342_s10  ;;  %s2564_s6 = smov (!%p103_p2), 64  }
   0x6   : > { %106 = sbr.rel (%p103_p2) target bundleno = 688 (0x2b0), region = 28  ;;  %s2565_s7 = smov (!%p103_p2), 96  }
   0x7   : > { %s2759_s30 = scalar_lea.vmem (!%p103_p2), %s4060_s0, %s2348_s17  ;;  %s120_s8 = smul.u32 (!%p103_p2), 14, %s2342_s10 }
   0x9   : > { %p121_p3 = scmp.lt.s32.totalorder (!%p103_p2), %s120_s8, 27 }
   0xb   : > { %v257_v0 = vld [vmem:[%s4061_s1 + $0x78] sm:$0xff]  ;;  %v256_v1 = vld [vmem:[%s4061_s1 + $0x70] sm:$0xff]  ;;  %v255_v3 = vld [vmem:[%s4061_s1 + $0x68] sm:$0xff]  ;;  %vm443_vm0 = vcmask 785408   ;;  %vm1905_vm1 = vcmask 1045504   ;;  %vm1582_vm2 = vcmask 1046528  }
   0xc   : > { %258 = vmatpush.msra.mxu0 %v257_v0  ;;  %2498 = vmatpush.msra.mxu3 %v257_v0  ;;  %v2598_v2 = vld [vmem:[%s4061_s1 + $0xf8] sm:$0xff]  ;;  %v2607_v4 = vld [vmem:[%s4061_s1 + $0xf0] sm:$0xff]  ;;  %v2612_v5 = vld [vmem:[%s4061_s1 + $0xe8] sm:$0xff]  ;;  %s4064_s8 = smov (!%p121_p3, %s120_s8), 27  ;;  %vm2228_vm3 = vcmask 261120   ;;  %vm2232_vm4 = vcmask 257024  }
   0xd   : > { %632 = vmatpush.msra.mxu1 %v2598_v2  ;;  %v2617_v6 = vld [vmem:[%s4061_s1 + $0x178] sm:$0xff]  ;;  %v254_v7 = vld [vmem:[%s4061_s1 + $0x60] sm:$0xff]  ;;  %v2627_v8 = vld [vmem:[%s4061_s1 + $0x170] sm:$0xff]  ;;  %s2497_s10 = sshll.u32 %s4064_s8, 5 }
   0xe   : > { %259 = vmatpush.msra.mxu0 %v256_v1  ;;  %2499 = vmatpush.msra.mxu3 %v256_v1  ;;  %v2632_v9 = vld [vmem:[%s4061_s1 + $0xe0] sm:$0xff]  ;;  %v2637_v10 = vld [vmem:[%s4061_s1 + $0x168] sm:$0xff]  ;;  %v253_v11 = vld [vmem:[%s4061_s1 + $0x58] sm:$0xff]  ;;  %s3393_s13 = scalar_lea.vmem %s4062_s2, %s2497_s10 }
   0xf   : > { %633 = vmatpush.msra.mxu1 %v2607_v4  ;;  %1117 = vmatpush.msra.mxu2 %v2617_v6  ;;  %v2647_v12 = vld [vmem:[%s4061_s1 + $0xd8] sm:$0xff]  ;;  %v2652_v13 = vld [vmem:[%s4061_s1 + $0x160] sm:$0xff]  ;;  %v252_v14 = vld [vmem:[%s4061_s1 + $0x50] sm:$0xff] }
  0x10   : > { %260 = vmatpush.msra.mxu0 %v255_v3  ;;  %2500 = vmatpush.msra.mxu3 %v255_v3  ;;  %v2662_v15 = vld [vmem:[%s4061_s1 + $0xd0] sm:$0xff]  ;;  %v2667_v16 = vld [vmem:[%s4061_s1 + $0x158] sm:$0xff]  ;;  %v251_v17 = vld [vmem:[%s4061_s1 + $0x48] sm:$0xff] }
  0x11   : > { %634 = vmatpush.msra.mxu1 %v2612_v5  ;;  %1118 = vmatpush.msra.mxu2 %v2627_v8  ;;  %v2677_v18 = vld [vmem:[%s4061_s1 + $0xc8] sm:$0xff]  ;;  %v2682_v19 = vld [vmem:[%s4061_s1 + $0x150] sm:$0xff]  ;;  %v250_v20 = vld [vmem:[%s4061_s1 + $0x40] sm:$0xff] }
  0x12   : > { %261 = vmatpush.msra.mxu0 %v254_v7  ;;  %2501 = vmatpush.msra.mxu3 %v254_v7  ;;  %v2692_v21 = vld [vmem:[%s4061_s1 + $0xc0] sm:$0xff]  ;;  %v2697_v22 = vld [vmem:[%s4061_s1 + $0x148] sm:$0xff]  ;;  %v249_v23 = vld [vmem:[%s4061_s1 + $0x38] sm:$0xff] }
  0x13   : > { %635 = vmatpush.msra.mxu1 %v2632_v9  ;;  %1119 = vmatpush.msra.mxu2 %v2637_v10  ;;  %v2707_v24 = vld [vmem:[%s4061_s1 + $0xb8] sm:$0xff]  ;;  %v2712_v25 = vld [vmem:[%s4061_s1 + $0x140] sm:$0xff]  ;;  %v248_v26 = vld [vmem:[%s4061_s1 + $0x30] sm:$0xff] }
  0x14   : > { %262 = vmatpush.msra.mxu0 %v253_v11  ;;  %2502 = vmatpush.msra.mxu3 %v253_v11  ;;  %v2722_v27 = vld [vmem:[%s4061_s1 + $0xb0] sm:$0xff]  ;;  %v2727_v28 = vld [vmem:[%s4061_s1 + $0x138] sm:$0xff]  ;;  %v247_v29 = vld [vmem:[%s4061_s1 + $0x28] sm:$0xff] }
  0x15   : > { %636 = vmatpush.msra.mxu1 %v2647_v12  ;;  %1120 = vmatpush.msra.mxu2 %v2652_v13  ;;  %v2739_v30 = vld [vmem:[%s4061_s1 + $0xa8] sm:$0xff]  ;;  %v2744_v31 = vld [vmem:[%s4061_s1 + $0x130] sm:$0xff]  ;;  %v246_v32 = vld [vmem:[%s4061_s1 + $0x20] sm:$0xff] }
  0x16   : > { %263 = vmatpush.msra.mxu0 %v252_v14  ;;  %2503 = vmatpush.msra.mxu3 %v252_v14  ;;  %v2754_v33 = vld [vmem:[%s4061_s1 + $0xa0] sm:$0xff]  ;;  %v2764_v34 = vld [vmem:[%s4061_s1 + $0x128] sm:$0xff]  ;;  %v245_v35 = vld [vmem:[%s4061_s1 + $0x18] sm:$0xff] }
  0x17   : > { %637 = vmatpush.msra.mxu1 %v2662_v15  ;;  %1121 = vmatpush.msra.mxu2 %v2667_v16  ;;  %v2774_v36 = vld [vmem:[%s4061_s1 + $0x98] sm:$0xff]  ;;  %v2779_v37 = vld [vmem:[%s4061_s1 + $0x120] sm:$0xff]  ;;  %v244_v38 = vld [vmem:[%s4061_s1 + $0x10] sm:$0xff] }
  0x18   : > { %264 = vmatpush.msra.mxu0 %v251_v17  ;;  %2504 = vmatpush.msra.mxu3 %v251_v17  ;;  %v130_v39 = vld [vmem:[%s2759_s30] sm:$0xff]  ;;  %v172_v40 = vld [vmem:[%s2759_s30 + $0x150] sm:$0xff]  ;;  %v2796_v42 = vld [vmem:[%s4061_s1 + $0x118] sm:$0xff] }
  0x19   : > { %638 = vmatpush.msra.mxu1 %v2677_v18  ;;  %1122 = vmatpush.msra.mxu2 %v2682_v19  ;;  %v2791_v41 = vld [vmem:[%s4061_s1 + $0x90] sm:$0xff]  ;;  %v243_v43 = vld [vmem:[%s4061_s1 + $0x8] sm:$0xff]  ;;  %v2814_v46 = vld [vmem:[%s2759_s30 + $0x20] sm:$0xff]  ;;  %v186_v48 = vmax.f32 %v130_v39, 0.0  ;;  %v228_v49 = vmax.f32 %v172_v40, 0.0 }
  0x1a   : > { %265 = vmatpush.msra.mxu0 %v250_v20  ;;  %2505 = vmatpush.msra.mxu3 %v250_v20  ;;  %v2806_v44 = vld [vmem:[%s4061_s1 + $0x88] sm:$0xff]  ;;  %v2811_v45 = vld [vmem:[%s4061_s1 + $0x110] sm:$0xff]  ;;  %v242_v47 = vld [vmem:[%s4061_s1] sm:$0xff]  ;;  %v559_v51 = vmax.f32 %v2814_v46, 0.0 }
  0x1b   : > { %639 = vmatpush.msra.mxu1 %v2692_v21  ;;  %1123 = vmatpush.msra.mxu2 %v2697_v22  ;;  %v2825_v50 = vld [vmem:[%s4061_s1 + $0x80] sm:$0xff]  ;;  %v2833_v53 = vld [vmem:[%s4061_s1 + $0x108] sm:$0xff]  ;;  %v173_v55 = vld [vmem:[%s2759_s30 + $0x158] sm:$0xff] }
  0x1c   : > { %266 = vmatpush.msra.mxu0 %v249_v23  ;;  %2506 = vmatpush.msra.mxu3 %v249_v23  ;;  %v2423_v52 = vld [vmem:[%s2759_s30 + $0x40] sm:$0xff]  ;;  %v131_v54 = vld [vmem:[%s2759_s30 + $0x8] sm:$0xff]  ;;  %v229_v60 = vmax.f32 %v173_v55, 0.0  ;;  %v132_v63 = vld [vmem:[%s2759_s30 + $0x10] sm:$0xff] }
  0x1d   : > { %640 = vmatpush.msra.mxu1 %v2707_v24  ;;  %1124 = vmatpush.msra.mxu2 %v2712_v25  ;;  %v2842_v56 = vld [vmem:[%s4061_s1 + $0x100] sm:$0xff]  ;;  %v2844_v57 = vmax.f32 %v2423_v52, 0.0  ;;  %v2851_v58 = vld [vmem:[%s2759_s30 + $0x28] sm:$0xff]  ;;  %v187_v59 = vmax.f32 %v131_v54, 0.0  ;;  %v188_v3 = vmax.f32 %v132_v63, 0.0  ;;  %v2425_v7 = vld [vmem:[%s2759_s30 + $0x50] sm:$0xff] }
  0x1e   : > { %267 = vmatpush.msra.mxu0 %v248_v26  ;;  %2507 = vmatpush.msra.mxu3 %v248_v26  ;;  %v560_v61 = vmax.f32 %v2851_v58, 0.0  ;;  %v2424_v62 = vld [vmem:[%s2759_s30 + $0x48] sm:$0xff]  ;;  %v174_v0 = vld [vmem:[%s2759_s30 + $0x160] sm:$0xff]  ;;  %v2353_v14 = vld [vmem:[%s2759_s30 + $0x38] sm:$0xff] }
  0x1f   : > { %641 = vmatpush.msra.mxu1 %v2722_v27  ;;  %1125 = vmatpush.msra.mxu2 %v2727_v28  ;;  %v2861_v1 = vmax.f32 %v2424_v62, 0.0  ;;  %v175_v11 = vld [vmem:[%s2759_s30 + $0x168] sm:$0xff]  ;;  %v2426_v20 = vld [vmem:[%s2759_s30 + $0x58] sm:$0xff]  ;;  %v2427_v26 = vld [vmem:[%s2759_s30 + $0x60] sm:$0xff] }
  0x20   : > { %268 = vmatpush.msra.mxu0 %v247_v29  ;;  %2508 = vmatpush.msra.mxu3 %v247_v29  ;;  %v231_v17 = vmax.f32 %v175_v11, 0.0  ;;  %v2884_v23 = vmax.f32 %v2426_v20, 0.0  ;;  %v2900_v29 = vmax.f32 %v2427_v26, 0.0  ;;  %v182_v39 = vld [vmem:[%s2759_s30 + $0x1a0] sm:$0xff]  ;;  %v2434_v46 = vld [vmem:[%s2759_s30 + $0x98] sm:$0xff]  ;;  %v2436_v54 = vld [vmem:[%s2759_s30 + $0xa8] sm:$0xff] }
  0x21   : > { %642 = vmatpush.msra.mxu1 %v2739_v30  ;;  %1126 = vmatpush.msra.mxu2 %v2744_v31  ;;  %v3004_v55 = vmax.f32 %v2436_v54, 0.0  ;;  %v2438_v58 = vld [vmem:[%s2759_s30 + $0xb8] sm:$0xff] }
  0x22   : > { %269 = vmatpush.msra.mxu0 %v246_v32  ;;  %2509 = vmatpush.msra.mxu3 %v246_v32  ;;  %v2428_v32 = vld [vmem:[%s2759_s30 + $0x68] sm:$0xff] }
  0x23   : > { %643 = vmatpush.msra.mxu1 %v2754_v33  ;;  %1127 = vmatpush.msra.mxu2 %v2764_v34 }
  0x24   : > { %270 = vmatpush.msra.mxu0 %v245_v35  ;;  %2510 = vmatpush.msra.mxu3 %v245_v35  ;;  %v181_v35 = vld [vmem:[%s2759_s30 + $0x198] sm:$0xff] }
  0x25   : > { %644 = vmatpush.msra.mxu1 %v2774_v36  ;;  %1128 = vmatpush.msra.mxu2 %v2779_v37 }
  0x26   : > { %271 = vmatpush.msra.mxu0 %v244_v38  ;;  %2511 = vmatpush.msra.mxu3 %v244_v38  ;;  %v2432_v38 = vld [vmem:[%s2759_s30 + $0x88] sm:$0xff] }
  0x27   : > { %645 = vmatpush.msra.mxu1 %v2791_v41  ;;  %1129 = vmatpush.msra.mxu2 %v2796_v42  ;;  %v2961_v40 = vmax.f32 %v2432_v38, 0.0 }
  0x28   : > { %272 = vmatpush.msra.mxu0 %v243_v43  ;;  %2512 = vmatpush.msra.mxu3 %v243_v43  ;;  %v2971_v43 = vld [vmem:[%s2759_s30 + $0x1a8] sm:$0xff] }
  0x29   : > { %646 = vmatpush.msra.mxu1 %v2806_v44  ;;  %1130 = vmatpush.msra.mxu2 %v2811_v45 }
  0x2a   : > { %273 = vmatpush.msra.mxu0 %v242_v47  ;;  %2513 = vmatpush.msra.mxu3 %v242_v47  ;;  %v2983_v47 = vld [vmem:[%s2759_s30 + $0x1b0] sm:$0xff] }
  0x2b   : > { %274 = vmatmul.f32.vlgmr.msra.gmra.mxu0 %v186_v48  ;;  %400 = vmatmul.f32.vlgmr.msra.gmra.mxu3 %v228_v49  ;;  %v2985_v48 = vmax.f32 %v2434_v46, 0.0  ;;  %v240_v49 = vmax.f32 %v2983_v47, 0.0 }
  0x2c   : > { %2514 = vmatpush.msrb.mxu3 %v2598_v2  ;;  %647 = vmatpush.msra.mxu1 %v2825_v50  ;;  %v2352_v2 = vld [vmem:[%s2759_s30 + $0x30] sm:$0xff] }
  0x2d   : > { %648 = vmatmul.f32.vlgmr.msra.gmra.mxu1 %v559_v51  ;;  %1131 = vmatpush.msra.mxu2 %v2833_v53 }
  0x2e   : > { %2515 = vmatpush.msrb.mxu3 %v2607_v4  ;;  %v230_v4 = vmax.f32 %v174_v0, 0.0 }
  0x2f   : > { %1132 = vmatpush.msra.mxu2 %v2842_v56 }
  0x30   : > { %1133 = vmatmul.f32.vlgmr.msra.gmra.mxu2 %v2844_v57  ;;  %2516 = vmatpush.msrb.mxu3 %v2612_v5  ;;  %v561_v5 = vmax.f32 %v2352_v2, 0.0 }
  0x32   : > { %2517 = vmatpush.msrb.mxu3 %v2632_v9  ;;  %v133_v9 = vld [vmem:[%s2759_s30 + $0x18] sm:$0xff] }
  0x33   : > { %277 = vmatmul.f32.gmra.mxu0 %v187_v59  ;;  %403 = vmatmul.f32.gmra.mxu3 %v229_v60  ;;  %v3019_v59 = vmax.f32 %v2438_v58, 0.0 }
  0x34   : > { %2518 = vmatpush.msrb.mxu3 %v2647_v12  ;;  %v2872_v12 = vmax.f32 %v2425_v7, 0.0 }
  0x35   : > { %651 = vmatmul.f32.gmra.mxu1 %v560_v61 }
  0x36   : > { %2519 = vmatpush.msrb.mxu3 %v2662_v15  ;;  %v189_v15 = vmax.f32 %v133_v9, 0.0 }
  0x38   : > { %1136 = vmatmul.f32.gmra.mxu2 %v2861_v1  ;;  %2520 = vmatpush.msrb.mxu3 %v2677_v18  ;;  %v562_v18 = vmax.f32 %v2353_v14, 0.0 }
  0x3a   : > { %2521 = vmatpush.msrb.mxu3 %v2692_v21  ;;  %v2882_v21 = vld [vmem:[%s2759_s30 + $0x170] sm:$0xff] }
  0x3b   : > { %280 = vmatmul.f32.gmra.mxu0 %v188_v3  ;;  %406 = vmatmul.f32.gmra.mxu3 %v230_v4  ;;  %v2440_v4 = vld [vmem:[%s2759_s30 + $0xc8] sm:$0xff] }
  0x3c   : > { %2522 = vmatpush.msrb.mxu3 %v2707_v24  ;;  %v232_v24 = vmax.f32 %v2882_v21, 0.0  ;;  %v3038_v9 = vmax.f32 %v2440_v4, 0.0 }
  0x3d   : > { %654 = vmatmul.f32.gmra.mxu1 %v561_v5 }
  0x3e   : > { %2523 = vmatpush.msrb.mxu3 %v2722_v27  ;;  %v2898_v27 = vld [vmem:[%s2759_s30 + $0x178] sm:$0xff] }
  0x40   : > { %1139 = vmatmul.f32.gmra.mxu2 %v2872_v12  ;;  %2524 = vmatpush.msrb.mxu3 %v2739_v30  ;;  %v233_v30 = vmax.f32 %v2898_v27, 0.0 }
  0x42   : > { %2525 = vmatpush.msrb.mxu3 %v2754_v33  ;;  %v2915_v33 = vmax.f32 %v2428_v32, 0.0  ;;  %v2442_v32 = vld [vmem:[%s2759_s30 + $0xd8] sm:$0xff] }
  0x43   : > { %283 = vmatmul.f32.gmra.mxu0 %v189_v15  ;;  %409 = vmatmul.f32.gmra.mxu3 %v231_v17  ;;  %v2441_v17 = vld [vmem:[%s2759_s30 + $0xd0] sm:$0xff] }
  0x44   : > { %2526 = vmatpush.msrb.mxu3 %v2774_v36 }
  0x45   : > { %657 = vmatmul.f32.gmra.mxu1 %v562_v18 }
  0x46   : > { %2527 = vmatpush.msrb.mxu3 %v2791_v41  ;;  %v2964_v41 = vmax.f32 %v182_v39, 0.0 }
  0x48   : > { %1142 = vmatmul.f32.gmra.mxu2 %v2884_v23  ;;  %2528 = vmatpush.msrb.mxu3 %v2806_v44 }
  0x4a   : > { %2529 = vmatpush.msrb.mxu3 %v2825_v50  ;;  %v2435_v50 = vld [vmem:[%s2759_s30 + $0xa0] sm:$0xff] }
  0x4b   : > { %286 = vmatmul.f32.gmra.mxu0 %v559_v51  ;;  %412 = vmatmul.f32.gmra.mxu3 %v232_v24  ;;  %v2994_v51 = vld [vmem:[%s2759_s30 + $0x1b8] sm:$0xff]  ;;  %v2996_v52 = vmax.f32 %v2435_v50, 0.0 }
  0x4c   : > { %2530 = vmatpush.msra.mxu3 %v2617_v6  ;;  %v2913_v6 = vld [vmem:[%s2759_s30 + $0x180] sm:$0xff] }
  0x4d   : > { %660 = vmatmul.f32.gmra.mxu1 %v2844_v57 }
  0x4e   : > { %2531 = vmatpush.msra.mxu3 %v2627_v8  ;;  %v234_v8 = vmax.f32 %v2913_v6, 0.0 }
  0x50   : > { %1145 = vmatmul.f32.gmra.mxu2 %v2900_v29  ;;  %2532 = vmatpush.msra.mxu3 %v2637_v10  ;;  %v2429_v10 = vld [vmem:[%s2759_s30 + $0x70] sm:$0xff] }
  0x52   : > { %2533 = vmatpush.msra.mxu3 %v2652_v13  ;;  %v2928_v13 = vld [vmem:[%s2759_s30 + $0x188] sm:$0xff] }
  0x53   : > { %289 = vmatmul.f32.gmra.mxu0 %v560_v61  ;;  %415 = vmatmul.f32.gmra.mxu3 %v233_v30  ;;  %v2439_v61 = vld [vmem:[%s2759_s30 + $0xc0] sm:$0xff] }
  0x54   : > { %2534 = vmatpush.msra.mxu3 %v2667_v16  ;;  %v2930_v16 = vmax.f32 %v2429_v10, 0.0  ;;  %v3027_v63 = vmax.f32 %v2439_v61, 0.0 }
  0x55   : > { %663 = vmatmul.f32.gmra.mxu1 %v2861_v1 }
  0x56   : > { %2535 = vmatpush.msra.mxu3 %v2682_v19  ;;  %v235_v19 = vmax.f32 %v2928_v13, 0.0  ;;  %v3059_v13 = vmax.f32 %v2442_v32, 0.0 }
  0x58   : > { %1148 = vmatmul.f32.gmra.mxu2 %v2915_v33  ;;  %2536 = vmatpush.msra.mxu3 %v2697_v22  ;;  %v2430_v22 = vld [vmem:[%s2759_s30 + $0x78] sm:$0xff] }
  0x5a   : > { %2537 = vmatpush.msra.mxu3 %v2712_v25  ;;  %v180_v25 = vld [vmem:[%s2759_s30 + $0x190] sm:$0xff] }
  0x5b   : > { %292 = vmatmul.f32.gmra.mxu0 %v561_v5  ;;  %418 = vmatmul.f32.gmra.mxu3 %v234_v8 }
  0x5c   : > { %2538 = vmatpush.msra.mxu3 %v2727_v28  ;;  %v1051_v28 = vmax.f32 %v2430_v22, 0.0 }
  0x5d   : > { %666 = vmatmul.f32.gmra.mxu1 %v2872_v12 }
  0x5e   : > { %2539 = vmatpush.msra.mxu3 %v2744_v31  ;;  %v2946_v31 = vmax.f32 %v180_v25, 0.0 }
  0x60   : > { %1151 = vmatmul.f32.gmra.mxu2 %v2930_v16  ;;  %2540 = vmatpush.msra.mxu3 %v2764_v34  ;;  %v2431_v34 = vld [vmem:[%s2759_s30 + $0x80] sm:$0xff] }
  0x61   : > { %v1052_v36 = vmax.f32 %v2431_v34, 0.0 }
  0x62   : > { %2541 = vmatpush.msra.mxu3 %v2779_v37  ;;  %v2955_v37 = vmax.f32 %v181_v35, 0.0 }
  0x63   : > { %295 = vmatmul.f32.gmra.mxu0 %v562_v18  ;;  %421 = vmatmul.f32.gmra.mxu3 %v235_v19 }
  0x64   : > { %2542 = vmatpush.msra.mxu3 %v2796_v42  ;;  %v2433_v42 = vld [vmem:[%s2759_s30 + $0x90] sm:$0xff] }
  0x65   : > { %669 = vmatmul.f32.gmra.mxu1 %v2884_v23  ;;  %v2973_v44 = vmax.f32 %v2433_v42, 0.0 }
  0x66   : > { %2543 = vmatpush.msra.mxu3 %v2811_v45  ;;  %v239_v45 = vmax.f32 %v2971_v43, 0.0 }
  0x68   : > { %1154 = vmatmul.f32.gmra.mxu2 %v1051_v28  ;;  %2544 = vmatpush.msra.mxu3 %v2833_v53  ;;  %v241_v53 = vmax.f32 %v2994_v51, 0.0 }
  0x6a   : > { %2545 = vmatpush.msra.mxu3 %v2842_v56  ;;  %v2437_v56 = vld [vmem:[%s2759_s30 + $0xb0] sm:$0xff] }
  0x6b   : > { %298 = vmatmul.f32.gmra.mxu0 %v2844_v57  ;;  %424 = vmatmul.f32.gmra.mxu3 %v2946_v31  ;;  %v3012_v57 = vmax.f32 %v2437_v56, 0.0 }
  0x6d   : > { %672 = vmatmul.f32.gmra.mxu1 %v2900_v29 }
  0x70   : > { %1157 = vmatmul.f32.gmra.mxu2 %v1052_v36 }
  0x73   : > { %301 = vmatmul.f32.gmra.mxu0 %v2861_v1  ;;  %427 = vmatmul.f32.gmra.mxu3 %v2955_v37 }
  0x75   : > { %675 = vmatmul.f32.gmra.mxu1 %v2915_v33 }
  0x78   : > { %1160 = vmatmul.f32.gmra.mxu2 %v2961_v40 }
  0x7b   : > { %304 = vmatmul.f32.gmra.mxu0 %v2872_v12  ;;  %430 = vmatmul.f32.gmra.mxu3 %v2964_v41 }
  0x7d   : > { %678 = vmatmul.f32.gmra.mxu1 %v2930_v16 }
  0x80   : > { %1163 = vmatmul.f32.gmra.mxu2 %v2973_v44 }
  0x83   : > { %307 = vmatmul.f32.gmra.mxu0 %v2884_v23  ;;  %433 = vmatmul.f32.gmra.mxu3 %v239_v45 }
  0x85   : > { %681 = vmatmul.f32.gmra.mxu1 %v1051_v28 }
  0x88   : > { %1166 = vmatmul.f32.gmra.mxu2 %v2985_v48 }
  0x8b   : > { %310 = vmatmul.f32.gmra.mxu0 %v2900_v29  ;;  %436 = vmatmul.f32.gmra.mxu3 %v240_v49 }
  0x8d   : > { %684 = vmatmul.f32.gmra.mxu1 %v1052_v36 }
  0x90   : > { %1169 = vmatmul.f32.gmra.mxu2 %v2996_v52 }
  0x93   : > { %313 = vmatmul.f32.gmra.mxu0 %v2915_v33  ;;  %439 = vmatmul.f32.gmra.mxu3 %v241_v53 }
  0x95   : > { %687 = vmatmul.f32.gmra.mxu1 %v2961_v40 }
  0x98   : > { %1172 = vmatmul.f32.gmra.mxu2 %v3004_v55 }
  0x9b   : > { %316 = vmatmul.f32.gmra.mxu0 %v2930_v16  ;;  %774 = vmatmul.f32.vlgmr.msrb.gmra.mxu3 %v232_v24  ;;  %v3048_v24 = vmax.f32 %v2441_v17, 0.0  ;;  %v2445_v17 = vld [vmem:[%s2759_s30 + $0xf0] sm:$0xff] }
  0x9d   : > { %690 = vmatmul.f32.gmra.mxu1 %v2973_v44 }
  0xa0   : > { %1175 = vmatmul.f32.gmra.mxu2 %v3012_v57 }
  0xa3   : > { %319 = vmatmul.f32.gmra.mxu0 %v1051_v28  ;;  %777 = vmatmul.f32.gmra.mxu3 %v233_v30  ;;  %v2443_v28 = vld [vmem:[%s2759_s30 + $0xe0] sm:$0xff] }
  0xa4   : > { %v3074_v42 = vmax.f32 %v2443_v28, 0.0 }
  0xa5   : > { %693 = vmatmul.f32.gmra.mxu1 %v2985_v48 }
  0xa8   : > { %v275_v60 = vpop.f32.mrf.mxu0  ;;  %1178 = vmatmul.f32.gmra.mxu2 %v3019_v59 }
  0xa9   : > { %444 = vst.msk [vmem:[#allocation2] sm:$0xff] %vm443_vm0, %v275_v60 }
  0xaa   : > { %v649_v62 = vpop.f32.mrf.mxu1 }
  0xab   : > { %322 = vmatmul.f32.gmra.mxu0 %v1052_v36  ;;  %780 = vmatmul.f32.gmra.mxu3 %v234_v8 }
  0xad   : > { %696 = vmatmul.f32.gmra.mxu1 %v2996_v52 }
  0xae   : > { %v401_v0 = vpop.f32.mrf.mxu3 }
  0xaf   : > { %486 = vst.msk [vmem:[#allocation2 + $0x150] sm:$0xff] %vm443_vm0, %v401_v0 }
  0xb0   : > { %v278_v1 = vpop.f32.mrf.mxu0  ;;  %v817_v2 = vld [vmem:[#allocation2] sm:$0xff]  ;;  %1181 = vmatmul.f32.gmra.mxu2 %v3027_v63 }
  0xb1   : > { %445 = vst.msk [vmem:[#allocation2 + $0x8] sm:$0xff] %vm443_vm0, %v278_v1  ;;  %v873_v3 = vadd.f32 %v817_v2, %v649_v62  ;;  %v2444_v1 = vld [vmem:[%s2759_s30 + $0xe8] sm:$0xff] }
  0xb2   : > { %v652_v5 = vpop.f32.mrf.mxu1 }
  0xb3   : > { %929 = vst.msk [vmem:[#allocation2] sm:$0xff] %vm443_vm0, %v873_v3  ;;  %325 = vmatmul.f32.gmra.mxu0 %v2961_v40  ;;  %783 = vmatmul.f32.gmra.mxu3 %v235_v19  ;;  %v1134_v7 = vpop.f32.mrf.mxu2 }
  0xb5   : > { %699 = vmatmul.f32.gmra.mxu1 %v3004_v55 }
  0xb6   : > { %v404_v11 = vpop.f32.mrf.mxu3 }
  0xb7   : > { %487 = vst.msk [vmem:[#allocation2 + $0x158] sm:$0xff] %vm443_vm0, %v404_v11 }
  0xb8   : > { %v281_v12 = vpop.f32.mrf.mxu0  ;;  %v818_v14 = vld [vmem:[#allocation2 + $0x8] sm:$0xff]  ;;  %1184 = vmatmul.f32.gmra.mxu2 %v3038_v9 }
  0xb9   : > { %446 = vst.msk [vmem:[#allocation2 + $0x10] sm:$0xff] %vm443_vm0, %v281_v12  ;;  %v874_v15 = vadd.f32 %v818_v14, %v652_v5 }
  0xba   : > { %v1302_v18 = vld [vmem:[#allocation2] sm:$0xff]  ;;  %v655_v20 = vpop.f32.mrf.mxu1 }
  0xbb   : > { %930 = vst.msk [vmem:[#allocation2 + $0x8] sm:$0xff] %vm443_vm0, %v874_v15  ;;  %v1358_v21 = vadd.f32 %v1302_v18, %v1134_v7  ;;  %328 = vmatmul.f32.gmra.mxu0 %v2973_v44  ;;  %786 = vmatmul.f32.gmra.mxu3 %v2946_v31  ;;  %v1137_v23 = vpop.f32.mrf.mxu2  ;;  %v3099_v7 = vmax.f32 %v2444_v1, 0.0 }
  0xbd   : > { %1414 = vst.msk [vmem:[#allocation2] sm:$0xff] %vm443_vm0, %v1358_v21  ;;  %702 = vmatmul.f32.gmra.mxu1 %v3012_v57 }
  0xbe   : > { %v407_v26 = vpop.f32.mrf.mxu3 }
  0xbf   : > { %488 = vst.msk [vmem:[#allocation2 + $0x160] sm:$0xff] %vm443_vm0, %v407_v26 }
  0xc0   : > { %v284_v27 = vpop.f32.mrf.mxu0  ;;  %v819_v29 = vld [vmem:[#allocation2 + $0x10] sm:$0xff]  ;;  %1187 = vmatmul.f32.gmra.mxu2 %v3048_v24 }
  0xc1   : > { %447 = vst.msk [vmem:[#allocation2 + $0x18] sm:$0xff] %vm443_vm0, %v284_v27  ;;  %v875_v30 = vadd.f32 %v819_v29, %v655_v20  ;;  %v3118_v29 = vmax.f32 %v2445_v17, 0.0  ;;  %v3183_v17 = vld [vmem:[%s2759_s30 + $0x1d0] sm:$0xff] }
  0xc2   : > { %v1303_v6 = vld [vmem:[#allocation2 + $0x8] sm:$0xff]  ;;  %v658_v33 = vpop.f32.mrf.mxu1 }
  0xc3   : > { %931 = vst.msk [vmem:[#allocation2 + $0x10] sm:$0xff] %vm443_vm0, %v875_v30  ;;  %v1359_v8 = vadd.f32 %v1303_v6, %v1137_v23  ;;  %331 = vmatmul.f32.gmra.mxu0 %v2985_v48  ;;  %789 = vmatmul.f32.gmra.mxu3 %v2955_v37  ;;  %v1140_v10 = vpop.f32.mrf.mxu2 }
  0xc4   : > { %v3067_v36 = vld [vmem:[#allocation2] sm:$0xff] }
  0xc5   : > { %1415 = vst.msk [vmem:[#allocation2 + $0x8] sm:$0xff] %vm443_vm0, %v1359_v8  ;;  %705 = vmatmul.f32.gmra.mxu1 %v3019_v59  ;;  %v1906_v44 = vrot.slane %v3067_v36, 2  ;;  %v1583_v48 = vrot.slane %v3067_v36, 1  ;;  %v2446_v8 = vld [vmem:[%s2759_s30 + $0xf8] sm:$0xff] }
  0xc6   : > { %v410_v16 = vpop.f32.mrf.mxu3 }
  0xc7   : > { %489 = vst.msk [vmem:[#allocation2 + $0x168] sm:$0xff] %vm443_vm0, %v410_v16 }
  0xc8   : > { %v287_v19 = vpop.f32.mrf.mxu0  ;;  %v820_v22 = vld [vmem:[#allocation2 + $0x18] sm:$0xff]  ;;  %1190 = vmatmul.f32.gmra.mxu2 %v3059_v13 }
  0xc9   : > { %448 = vst.msk [vmem:[#allocation2 + $0x20] sm:$0xff] %vm443_vm0, %v287_v19  ;;  %v876_v25 = vadd.f32 %v820_v22, %v658_v33  ;;  %v3133_v19 = vld [vmem:[%s2759_s30 + $0x1c0] sm:$0xff]  ;;  %v3137_v22 = vmax.f32 %v2446_v8, 0.0 }
  0xca   : > { %v1304_v34 = vld [vmem:[#allocation2 + $0x10] sm:$0xff]  ;;  %v661_v35 = vpop.f32.mrf.mxu1  ;;  %v611_v51 = vmax.f32 %v3133_v19, 0.0 }
  0xcb   : > { %932 = vst.msk [vmem:[#allocation2 + $0x18] sm:$0xff] %vm443_vm0, %v876_v25  ;;  %v1360_v38 = vadd.f32 %v1304_v34, %v1140_v10  ;;  %334 = vmatmul.f32.gmra.mxu0 %v2996_v52  ;;  %792 = vmatmul.f32.gmra.mxu3 %v2964_v41  ;;  %v1143_v39 = vpop.f32.mrf.mxu2 }
  0xcc   : > { %v3072_v40 = vld [vmem:[#allocation2 + $0x8] sm:$0xff] }
  0xcd   : > { %1416 = vst.msk [vmem:[#allocation2 + $0x10] sm:$0xff] %vm443_vm0, %v1360_v38  ;;  %v1907_v46 = vrot.slane %v3072_v40, 2  ;;  %v1584_v50 = vrot.slane %v3072_v40, 1  ;;  %708 = vmatmul.f32.gmra.mxu1 %v3027_v63 }
  0xce   : > { %v413_v52 = vpop.f32.mrf.mxu3 }
  0xcf   : > { %490 = vst.msk [vmem:[#allocation2 + $0x170] sm:$0xff] %vm443_vm0, %v413_v52  ;;  %v1908_v54 = vsel %vm1905_vm1, %v1906_v44, %v1907_v46  ;;  %v1585_v56 = vsel %vm1582_vm2, %v1583_v48, %v1584_v50  ;;  %v3155_v52 = vld [vmem:[%s2759_s30 + $0x1c8] sm:$0xff] }
  0xd0   : > { %v821_v58 = vld [vmem:[#allocation2 + $0x20] sm:$0xff]  ;;  %2004 = vrot.lane.b32.xlu2 %v1908_v54, %s2564_s6  ;;  %1681 = vrot.lane.b32.xlu0 %v1585_v56, %s2565_s7  ;;  %v290_v60 = vpop.f32.mrf.mxu0 }
  0xd1   : > { %v877_v61 = vadd.f32 %v821_v58, %v661_v35  ;;  %449 = vst.msk [vmem:[#allocation2 + $0x28] sm:$0xff] %vm443_vm0, %v290_v60  ;;  %1193 = vmatmul.f32.gmra.mxu2 %v3074_v42  ;;  %v2447_v35 = vld [vmem:[%s2759_s30 + $0x100] sm:$0xff] }
  0xd2   : > { %v1305_v62 = vld [vmem:[#allocation2 + $0x18] sm:$0xff]  ;;  %v664_v0 = vpop.f32.mrf.mxu1  ;;  %v3157_v54 = vmax.f32 %v2447_v35, 0.0 }
  0xd3   : > { %933 = vst.msk [vmem:[#allocation2 + $0x20] sm:$0xff] %vm443_vm0, %v877_v61  ;;  %v1361_v2 = vadd.f32 %v1305_v62, %v1143_v39  ;;  %337 = vmatmul.f32.gmra.mxu0 %v3004_v55  ;;  %795 = vmatmul.f32.gmra.mxu3 %v239_v45  ;;  %v1146_v3 = vpop.f32.mrf.mxu2 }
  0xd4   : > { %v3094_v4 = vld [vmem:[#allocation2 + $0x10] sm:$0xff] }
  0xd5   : > { %1417 = vst.msk [vmem:[#allocation2 + $0x18] sm:$0xff] %vm443_vm0, %v1361_v2  ;;  %v1586_v5 = vrot.slane %v3094_v4, 1  ;;  %711 = vmatmul.f32.gmra.mxu1 %v3038_v9  ;;  %v1909_v20 = vrot.slane %v3094_v4, 2  ;;  %v612_v2 = vmax.f32 %v3155_v52, 0.0 }
  0xd6   : > { %v416_v11 = vpop.f32.mrf.mxu3 }
  0xd7   : > { %491 = vst.msk [vmem:[#allocation2 + $0x178] sm:$0xff] %vm443_vm0, %v416_v11  ;;  %v1587_v55 = vsel %vm1582_vm2, %v1584_v50, %v1586_v5  ;;  %v1910_v47 = vsel %vm1905_vm1, %v1907_v46, %v1909_v20 }
  0xd8   : > { %v822_v12 = vld [vmem:[#allocation2 + $0x28] sm:$0xff]  ;;  %1683 = vrot.lane.b32.xlu0 %v1587_v55, %s2565_s7  ;;  %v293_v43 = vpop.f32.mrf.mxu0 }
  0xd9   : > { %v878_v45 = vadd.f32 %v822_v12, %v664_v0  ;;  %450 = vst.msk [vmem:[#allocation2 + $0x30] sm:$0xff] %vm443_vm0, %v293_v43  ;;  %1196 = vmatmul.f32.gmra.mxu2 %v3099_v7  ;;  %v2448_v43 = vld [vmem:[%s2759_s30 + $0x108] sm:$0xff] }
  0xda   : > { %v1306_v14 = vld [vmem:[#allocation2 + $0x20] sm:$0xff]  ;;  %v667_v15 = vpop.f32.mrf.mxu1 }
  0xdb   : > { %934 = vst.msk [vmem:[#allocation2 + $0x28] sm:$0xff] %vm443_vm0, %v878_v45  ;;  %v1362_v18 = vadd.f32 %v1306_v14, %v1146_v3  ;;  %340 = vmatmul.f32.gmra.mxu0 %v3012_v57  ;;  %798 = vmatmul.f32.gmra.mxu3 %v240_v49  ;;  %v1149_v21 = vpop.f32.mrf.mxu2 }
  0xdc   : > { %v3112_v23 = vld [vmem:[#allocation2 + $0x18] sm:$0xff] }
  0xdd   : > { %1418 = vst.msk [vmem:[#allocation2 + $0x20] sm:$0xff] %vm443_vm0, %v1362_v18  ;;  %v1911_v26 = vrot.slane %v3112_v23, 2  ;;  %v1588_v27 = vrot.slane %v3112_v23, 1  ;;  %714 = vmatmul.f32.gmra.mxu1 %v3048_v24 }
  0xde   : > { %v419_v57 = vpop.f32.mrf.mxu3 }
  0xdf   : > { %492 = vst.msk [vmem:[#allocation2 + $0x180] sm:$0xff] %vm443_vm0, %v419_v57  ;;  %2010 = vrot.lane.b32.xlu2 %v1911_v26, %s2564_s6  ;;  %1687 = vrot.lane.b32.xlu1 %v1588_v27, %s2565_s7  ;;  %v1589_v28 = vsel %vm1582_vm2, %v1586_v5, %v1588_v27  ;;  %v1912_v62 = vsel %vm1905_vm1, %v1909_v20, %v1911_v26  ;;  %v613_v57 = vmax.f32 %v3183_v17, 0.0 }
  0xe0   : > { %v823_v49 = vld [vmem:[#allocation2 + $0x30] sm:$0xff]  ;;  %2006 = vrot.lane.b32.xlu0 %v1910_v47, %s2564_s6  ;;  %v296_v30 = vpop.f32.mrf.mxu0 }
  0xe1   : > { %v879_v32 = vadd.f32 %v823_v49, %v667_v15  ;;  %451 = vst.msk [vmem:[#allocation2 + $0x38] sm:$0xff] %vm443_vm0, %v296_v30  ;;  %1199 = vmatmul.f32.gmra.mxu2 %v3118_v29 }
  0xe2   : > { %v1307_v6 = vld [vmem:[#allocation2 + $0x28] sm:$0xff]  ;;  %v670_v33 = vpop.f32.mrf.mxu1 }
  0xe3   : > { %935 = vst.msk [vmem:[#allocation2 + $0x30] sm:$0xff] %vm443_vm0, %v879_v32  ;;  %v1363_v10 = vadd.f32 %v1307_v6, %v1149_v21  ;;  %343 = vmatmul.f32.gmra.mxu0 %v3019_v59  ;;  %801 = vmatmul.f32.gmra.mxu3 %v241_v53  ;;  %v1152_v16 = vpop.f32.mrf.mxu2  ;;  %v3189_v21 = vmax.f32 %v2448_v43, 0.0 }
  0xe4   : > { %v3146_v44 = vld [vmem:[#allocation2 + $0x20] sm:$0xff] }
  0xe5   : > { %1419 = vst.msk [vmem:[#allocation2 + $0x28] sm:$0xff] %vm443_vm0, %v1363_v10  ;;  %717 = vmatmul.f32.gmra.mxu1 %v3059_v13  ;;  %v1913_v56 = vrot.slane %v3146_v44, 2  ;;  %v1590_v60 = vrot.slane %v3146_v44, 1 }
  0xe6   : > { %v422_v25 = vpop.f32.mrf.mxu3 }
  0xe7   : > { %493 = vst.msk [vmem:[#allocation2 + $0x188] sm:$0xff] %vm443_vm0, %v422_v25  ;;  %1685 = vrot.lane.b32.xlu1 %v1589_v28, %s2565_s7  ;;  %v3207_v25 = vld [vmem:[%s2759_s30 + $0x1d8] sm:$0xff] }
  0xe8   : > { %v299_v53 = vpop.f32.mrf.mxu0  ;;  %v824_v59 = vld [vmem:[#allocation2 + $0x38] sm:$0xff]  ;;  %v614_v35 = vmax.f32 %v3207_v25, 0.0 }
  0xe9   : > { %452 = vst.msk [vmem:[#allocation2 + $0x40] sm:$0xff] %vm443_vm0, %v299_v53  ;;  %v880_v34 = vadd.f32 %v824_v59, %v670_v33  ;;  %1202 = vmatmul.f32.gmra.mxu2 %v3137_v22  ;;  %v2449_v33 = vld [vmem:[%s2759_s30 + $0x110] sm:$0xff] }
  0xea   : > { %v1308_v38 = vld [vmem:[#allocation2 + $0x30] sm:$0xff]  ;;  %v673_v39 = vpop.f32.mrf.mxu1  ;;  %v3213_v59 = vmax.f32 %v2449_v33, 0.0 }
  0xeb   : > { %936 = vst.msk [vmem:[#allocation2 + $0x38] sm:$0xff] %vm443_vm0, %v880_v34  ;;  %v1364_v46 = vadd.f32 %v1308_v38, %v1152_v16  ;;  %346 = vmatmul.f32.gmra.mxu0 %v3027_v63  ;;  %804 = vmatmul.f32.gmra.mxu3 %v611_v51  ;;  %v1155_v48 = vpop.f32.mrf.mxu2 }
  0xec   : > { %v3152_v50 = vld [vmem:[#allocation2 + $0x28] sm:$0xff] }
  0xed   : > { %1420 = vst.msk [vmem:[#allocation2 + $0x30] sm:$0xff] %vm443_vm0, %v1364_v46  ;;  %v1914_v58 = vrot.slane %v3152_v50, 2  ;;  %v1591_v63 = vrot.slane %v3152_v50, 1  ;;  %720 = vmatmul.f32.gmra.mxu1 %v3074_v42 }
  0xee   : > { %v425_v61 = vpop.f32.mrf.mxu3  ;;  %v866_v25 = vld [vmem:[#allocation2 + $0x188] sm:$0xff] }
  0xef   : > { %494 = vst.msk [vmem:[#allocation2 + $0x190] sm:$0xff] %vm443_vm0, %v425_v61  ;;  %2008 = vrot.lane.b32.xlu1 %v1912_v62, %s2564_s6  ;;  %v1915_v0 = vsel %vm1905_vm1, %v1913_v56, %v1914_v58  ;;  %v1592_v1 = vsel %vm1582_vm2, %v1590_v60, %v1591_v63 }
  0xf0   : > { %v825_v3 = vld [vmem:[#allocation2 + $0x40] sm:$0xff]  ;;  %2012 = vrot.lane.b32.xlu0 %v1915_v0, %s2564_s6  ;;  %1689 = vrot.lane.b32.xlu2 %v1592_v1, %s2565_s7  ;;  %v302_v5 = vpop.f32.mrf.mxu0 }
  0xf1   : > { %v881_v11 = vadd.f32 %v825_v3, %v673_v39  ;;  %453 = vst.msk [vmem:[#allocation2 + $0x48] sm:$0xff] %vm443_vm0, %v302_v5  ;;  %1205 = vmatmul.f32.gmra.mxu2 %v3157_v54  ;;  %v2451_v5 = vld [vmem:[%s2759_s30 + $0x120] sm:$0xff] }
  0xf2   : > { %v1309_v55 = vld [vmem:[#allocation2 + $0x38] sm:$0xff]  ;;  %v676_v12 = vpop.f32.mrf.mxu1 }
  0xf3   : > { %937 = vst.msk [vmem:[#allocation2 + $0x40] sm:$0xff] %vm443_vm0, %v881_v11  ;;  %v1365_v45 = vadd.f32 %v1309_v55, %v1155_v48  ;;  %349 = vmatmul.f32.gmra.mxu0 %v3038_v9  ;;  %807 = vmatmul.f32.gmra.mxu3 %v612_v2  ;;  %v1158_v14 = vpop.f32.mrf.mxu2 }
  0xf4   : > { %v3180_v15 = vld [vmem:[#allocation2 + $0x30] sm:$0xff] }
  0xf5   : > { %1421 = vst.msk [vmem:[#allocation2 + $0x38] sm:$0xff] %vm443_vm0, %v1365_v45  ;;  %v1916_v18 = vrot.slane %v3180_v15, 2  ;;  %v1593_v20 = vrot.slane %v3180_v15, 1  ;;  %723 = vmatmul.f32.gmra.mxu1 %v3099_v7 }
  0xf6   : > { %v428_v9 = vpop.f32.mrf.mxu3 }
  0xf7   : > { %495 = vst.msk [vmem:[#allocation2 + $0x198] sm:$0xff] %vm443_vm0, %v428_v9  ;;  %v1917_v26 = vsel %vm1905_vm1, %v1914_v58, %v1916_v18  ;;  %v1594_v27 = vsel %vm1582_vm2, %v1591_v63, %v1593_v20  ;;  %v2450_v58 = vld [vmem:[%s2759_s30 + $0x118] sm:$0xff] }
  0xf8   : > { %v826_v47 = vld [vmem:[#allocation2 + $0x48] sm:$0xff]  ;;  %2014 = vrot.lane.b32.xlu1 %v1917_v26, %s2564_s6  ;;  %1691 = vrot.lane.b32.xlu2 %v1594_v27, %s2565_s7  ;;  %v305_v49 = vpop.f32.mrf.mxu0  ;;  %v3230_v61 = vmax.f32 %v2450_v58, 0.0 }
  0xf9   : > { %v882_v30 = vadd.f32 %v826_v47, %v676_v12  ;;  %454 = vst.msk [vmem:[#allocation2 + $0x50] sm:$0xff] %vm443_vm0, %v305_v49  ;;  %1208 = vmatmul.f32.gmra.mxu2 %v3189_v21 }
  0xfa   : > { %v1310_v32 = vld [vmem:[#allocation2 + $0x40] sm:$0xff]  ;;  %v679_v6 = vpop.f32.mrf.mxu1 }
  0xfb   : > { %938 = vst.msk [vmem:[#allocation2 + $0x48] sm:$0xff] %vm443_vm0, %v882_v30  ;;  %v1366_v8 = vadd.f32 %v1310_v32, %v1158_v14  ;;  %352 = vmatmul.f32.gmra.mxu0 %v3048_v24  ;;  %810 = vmatmul.f32.gmra.mxu3 %v613_v57  ;;  %v1161_v10 = vpop.f32.mrf.mxu2 }
  0xfc   : > { %v3204_v16 = vld [vmem:[#allocation2 + $0x38] sm:$0xff] }
  0xfd   : > { %1422 = vst.msk [vmem:[#allocation2 + $0x40] sm:$0xff] %vm443_vm0, %v1366_v8  ;;  %v1918_v28 = vrot.slane %v3204_v16, 2  ;;  %v1595_v53 = vrot.slane %v3204_v16, 1  ;;  %726 = vmatmul.f32.gmra.mxu1 %v3118_v29  ;;  %v2452_v8 = vld [vmem:[%s2759_s30 + $0x128] sm:$0xff] }
  0xfe   : > { %v431_v24 = vpop.f32.mrf.mxu3 }
  0xff   : > { %496 = vst.msk [vmem:[#allocation2 + $0x1a0] sm:$0xff] %vm443_vm0, %v431_v24  ;;  %2018 = vrot.lane.b32.xlu0 %v1918_v28, %s2564_s6  ;;  %v1919_v34 = vsel %vm1905_vm1, %v1916_v18, %v1918_v28  ;;  %v1596_v0 = vsel %vm1582_vm2, %v1593_v20, %v1595_v53  ;;  %v3245_v18 = vmax.f32 %v2451_v5, 0.0 }
 0x100   : > { %v827_v38 = vld [vmem:[#allocation2 + $0x50] sm:$0xff]  ;;  %2016 = vrot.lane.b32.xlu2 %v1919_v34, %s2564_s6  ;;  %1695 = vrot.lane.b32.xlu1 %v1595_v53, %s2565_s7  ;;  %v308_v39 = vpop.f32.mrf.mxu0 }
 0x101   : > { %v883_v46 = vadd.f32 %v827_v38, %v679_v6  ;;  %455 = vst.msk [vmem:[#allocation2 + $0x58] sm:$0xff] %vm443_vm0, %v308_v39  ;;  %1211 = vmatmul.f32.gmra.mxu2 %v3213_v59  ;;  %v3270_v38 = vmax.f32 %v2452_v8, 0.0 }
 0x102   : > { %v1311_v48 = vld [vmem:[#allocation2 + $0x48] sm:$0xff]  ;;  %v682_v56 = vpop.f32.mrf.mxu1 }
 0x103   : > { %939 = vst.msk [vmem:[#allocation2 + $0x50] sm:$0xff] %vm443_vm0, %v883_v46  ;;  %v1367_v60 = vadd.f32 %v1311_v48, %v1161_v10  ;;  %355 = vmatmul.f32.gmra.mxu0 %v3059_v13  ;;  %813 = vmatmul.f32.gmra.mxu3 %v614_v35  ;;  %v1164_v63 = vpop.f32.mrf.mxu2 }
 0x104   : > { %v3238_v12 = vld [vmem:[#allocation2 + $0x40] sm:$0xff] }
 0x105   : > { %1423 = vst.msk [vmem:[#allocation2 + $0x48] sm:$0xff] %vm443_vm0, %v1367_v60  ;;  %729 = vmatmul.f32.gmra.mxu1 %v3137_v22  ;;  %v1920_v20 = vrot.slane %v3238_v12, 2  ;;  %v1597_v26 = vrot.slane %v3238_v12, 1 }
 0x106   : > { %v434_v62 = vpop.f32.mrf.mxu3 }
 0x107   : > { %497 = vst.msk [vmem:[#allocation2 + $0x1a8] sm:$0xff] %vm443_vm0, %v434_v62  ;;  %1693 = vrot.lane.b32.xlu0 %v1596_v0, %s2565_s7 }
 0x108   : > { %v311_v1 = vpop.f32.mrf.mxu0  ;;  %v828_v3 = vld [vmem:[#allocation2 + $0x58] sm:$0xff] }
 0x109   : > { %456 = vst.msk [vmem:[#allocation2 + $0x60] sm:$0xff] %vm443_vm0, %v311_v1  ;;  %v884_v13 = vadd.f32 %v828_v3, %v682_v56  ;;  %1214 = vmatmul.f32.gmra.mxu2 %v3230_v61  ;;  %v2468_v3 = vld [vmem:[%s2759_s30 + $0x1a8] sm:$0xff] }
 0x10a   : > { %v1312_v11 = vld [vmem:[#allocation2 + $0x50] sm:$0xff]  ;;  %v685_v55 = vpop.f32.mrf.mxu1 }
 0x10b   : > { %940 = vst.msk [vmem:[#allocation2 + $0x58] sm:$0xff] %vm443_vm0, %v884_v13  ;;  %v1368_v43 = vadd.f32 %v1312_v11, %v1164_v63  ;;  %358 = vmatmul.f32.gmra.mxu0 %v3074_v42  ;;  %1259 = vmatmul.f32.vlgmr.msra.gmra.mxu3 %v2946_v31  ;;  %v1167_v45 = vpop.f32.mrf.mxu2  ;;  %v2453_v63 = vld [vmem:[%s2759_s30 + $0x130] sm:$0xff] }
 0x10c   : > { %v3243_v14 = vld [vmem:[#allocation2 + $0x48] sm:$0xff]  ;;  %v3290_v11 = vmax.f32 %v2453_v63, 0.0 }
 0x10d   : > { %1424 = vst.msk [vmem:[#allocation2 + $0x50] sm:$0xff] %vm443_vm0, %v1368_v43  ;;  %v1921_v9 = vrot.slane %v3243_v14, 2  ;;  %v1598_v27 = vrot.slane %v3243_v14, 1  ;;  %732 = vmatmul.f32.gmra.mxu1 %v3157_v54  ;;  %v859_v43 = vld [vmem:[#allocation2 + $0x150] sm:$0xff] }
 0x10e   : > { %v437_v42 = vpop.f32.mrf.mxu3 }
 0x10f   : > { %498 = vst.msk [vmem:[#allocation2 + $0x1b0] sm:$0xff] %vm443_vm0, %v437_v42  ;;  %v1922_v31 = vsel %vm1905_vm1, %v1920_v20, %v1921_v9  ;;  %v1599_v47 = vsel %vm1582_vm2, %v1597_v26, %v1598_v27 }
 0x110   : > { %v829_v49 = vld [vmem:[#allocation2 + $0x60] sm:$0xff]  ;;  %2020 = vrot.lane.b32.xlu1 %v1922_v31, %s2564_s6  ;;  %1697 = vrot.lane.b32.xlu2 %v1599_v47, %s2565_s7  ;;  %v314_v30 = vpop.f32.mrf.mxu0  ;;  %v2454_v31 = vld [vmem:[%s2759_s30 + $0x138] sm:$0xff] }
 0x111   : > { %v885_v32 = vadd.f32 %v829_v49, %v685_v55  ;;  %457 = vst.msk [vmem:[#allocation2 + $0x68] sm:$0xff] %vm443_vm0, %v314_v30  ;;  %1217 = vmatmul.f32.gmra.mxu2 %v3245_v18  ;;  %v2469_v30 = vld [vmem:[%s2759_s30 + $0x1b0] sm:$0xff] }
 0x112   : > { %v1313_v6 = vld [vmem:[#allocation2 + $0x58] sm:$0xff]  ;;  %v688_v33 = vpop.f32.mrf.mxu1 }
 0x113   : > { %941 = vst.msk [vmem:[#allocation2 + $0x60] sm:$0xff] %vm443_vm0, %v885_v32  ;;  %v1369_v10 = vadd.f32 %v1313_v6, %v1167_v45  ;;  %361 = vmatmul.f32.gmra.mxu0 %v3099_v7  ;;  %1262 = vmatmul.f32.gmra.mxu3 %v2955_v37  ;;  %v1170_v28 = vpop.f32.mrf.mxu2  ;;  %v1089_v45 = vmax.f32 %v2468_v3, 0.0  ;;  %v3305_v32 = vmax.f32 %v2454_v31, 0.0 }
 0x114   : > { %v3264_v53 = vld [vmem:[#allocation2 + $0x50] sm:$0xff] }
 0x115   : > { %1425 = vst.msk [vmem:[#allocation2 + $0x58] sm:$0xff] %vm443_vm0, %v1369_v10  ;;  %v1923_v24 = vrot.slane %v3264_v53, 2  ;;  %v1600_v34 = vrot.slane %v3264_v53, 1  ;;  %735 = vmatmul.f32.gmra.mxu1 %v3189_v21 }
 0x116   : > { %v440_v39 = vpop.f32.mrf.mxu3 }
 0x117   : > { %499 = vst.msk [vmem:[#allocation2 + $0x1b8] sm:$0xff] %vm443_vm0, %v440_v39  ;;  %v1924_v7 = vsel %vm1905_vm1, %v1921_v9, %v1923_v24  ;;  %v1601_v37 = vsel %vm1582_vm2, %v1598_v27, %v1600_v34  ;;  %v2455_v39 = vld [vmem:[%s2759_s30 + $0x140] sm:$0xff] }
 0x118   : > { %v830_v46 = vld [vmem:[#allocation2 + $0x68] sm:$0xff]  ;;  %2022 = vrot.lane.b32.xlu2 %v1924_v7, %s2564_s6  ;;  %1699 = vrot.lane.b32.xlu0 %v1601_v37, %s2565_s7  ;;  %v317_v48 = vpop.f32.mrf.mxu0  ;;  %v3320_v63 = vmax.f32 %v2455_v39, 0.0 }
 0x119   : > { %v886_v56 = vadd.f32 %v830_v46, %v688_v33  ;;  %458 = vst.msk [vmem:[#allocation2 + $0x70] sm:$0xff] %vm443_vm0, %v317_v48  ;;  %1220 = vmatmul.f32.gmra.mxu2 %v3270_v38  ;;  %v860_v33 = vld [vmem:[#allocation2 + $0x158] sm:$0xff] }
 0x11a   : > { %v1314_v58 = vld [vmem:[#allocation2 + $0x60] sm:$0xff]  ;;  %v691_v60 = vpop.f32.mrf.mxu1 }
 0x11b   : > { %942 = vst.msk [vmem:[#allocation2 + $0x68] sm:$0xff] %vm443_vm0, %v886_v56  ;;  %v1370_v62 = vadd.f32 %v1314_v58, %v1170_v28  ;;  %364 = vmatmul.f32.gmra.mxu0 %v3118_v29  ;;  %1265 = vmatmul.f32.gmra.mxu3 %v2964_v41  ;;  %v1173_v0 = vpop.f32.mrf.mxu2  ;;  %v1090_v28 = vmax.f32 %v2469_v30, 0.0 }
 0x11c   : > { %v3283_v1 = vld [vmem:[#allocation2 + $0x58] sm:$0xff] }
 0x11d   : > { %1426 = vst.msk [vmem:[#allocation2 + $0x60] sm:$0xff] %vm443_vm0, %v1370_v62  ;;  %v1925_v13 = vrot.slane %v3283_v1, 2  ;;  %v1602_v5 = vrot.slane %v3283_v1, 1  ;;  %738 = vmatmul.f32.gmra.mxu1 %v3213_v59 }
 0x11e   : > { %v775_v55 = vpop.f32.mrf.mxu3 }
 0x11f   : > { %v915_v29 = vadd.f32 %v859_v43, %v775_v55  ;;  %2026 = vrot.lane.b32.xlu1 %v1925_v13, %s2564_s6  ;;  %v1926_v41 = vsel %vm1905_vm1, %v1923_v24, %v1925_v13  ;;  %v1603_v8 = vsel %vm1582_vm2, %v1600_v34, %v1602_v5 }
 0x120   : > { %v831_v20 = vld [vmem:[#allocation2 + $0x70] sm:$0xff]  ;;  %2024 = vrot.lane.b32.xlu0 %v1926_v41, %s2564_s6  ;;  %1703 = vrot.lane.b32.xlu2 %v1602_v5, %s2565_s7  ;;  %v320_v9 = vpop.f32.mrf.mxu0  ;;  %v861_v5 = vld [vmem:[#allocation2 + $0x160] sm:$0xff] }
 0x121   : > { %971 = vst.msk [vmem:[#allocation2 + $0x150] sm:$0xff] %vm443_vm0, %v915_v29  ;;  %v887_v26 = vadd.f32 %v831_v20, %v691_v60  ;;  %1223 = vmatmul.f32.gmra.mxu2 %v3290_v11  ;;  %v2470_v60 = vld [vmem:[%s2759_s30 + $0x1b8] sm:$0xff] }
 0x122   : > { %459 = vst.msk [vmem:[#allocation2 + $0x78] sm:$0xff] %vm443_vm0, %v320_v9  ;;  %v1315_v27 = vld [vmem:[#allocation2 + $0x68] sm:$0xff]  ;;  %v694_v42 = vpop.f32.mrf.mxu1  ;;  %v1091_v41 = vmax.f32 %v2470_v60, 0.0 }
 0x123   : > { %943 = vst.msk [vmem:[#allocation2 + $0x70] sm:$0xff] %vm443_vm0, %v887_v26  ;;  %v1371_v47 = vadd.f32 %v1315_v27, %v1173_v0  ;;  %367 = vmatmul.f32.gmra.mxu0 %v3137_v22  ;;  %1268 = vmatmul.f32.gmra.mxu3 %v1089_v45  ;;  %v1176_v49 = vpop.f32.mrf.mxu2  ;;  %v2456_v27 = vld [vmem:[%s2759_s30 + $0x148] sm:$0xff] }
 0x124   : > { %v3313_v48 = vld [vmem:[#allocation2 + $0x60] sm:$0xff] }
 0x125   : > { %1427 = vst.msk [vmem:[#allocation2 + $0x68] sm:$0xff] %vm443_vm0, %v1371_v47  ;;  %741 = vmatmul.f32.gmra.mxu1 %v3230_v61  ;;  %v1927_v62 = vrot.slane %v3313_v48, 2  ;;  %v1604_v3 = vrot.slane %v3313_v48, 1 }
 0x126   : > { %v778_v6 = vpop.f32.mrf.mxu3 }
 0x127   : > { %v916_v10 = vadd.f32 %v860_v33, %v778_v6  ;;  %1701 = vrot.lane.b32.xlu1 %v1603_v8, %s2565_s7  ;;  %v3343_v33 = vmax.f32 %v2456_v27, 0.0  ;;  %v862_v8 = vld [vmem:[#allocation2 + $0x168] sm:$0xff] }
 0x128   : > { %v323_v24 = vpop.f32.mrf.mxu0 }
 0x129   : > { %972 = vst.msk [vmem:[#allocation2 + $0x158] sm:$0xff] %vm443_vm0, %v916_v10  ;;  %v832_v22 = vld [vmem:[#allocation2 + $0x78] sm:$0xff]  ;;  %1226 = vmatmul.f32.gmra.mxu2 %v3305_v32 }
 0x12a   : > { %460 = vst.msk [vmem:[#allocation2 + $0x80] sm:$0xff] %vm443_vm0, %v323_v24  ;;  %v888_v7 = vadd.f32 %v832_v22, %v694_v42  ;;  %v1316_v37 = vld [vmem:[#allocation2 + $0x70] sm:$0xff]  ;;  %v697_v46 = vpop.f32.mrf.mxu1  ;;  %v2005_v27 = vpop.permute.xlu2 %2004 }
 0x12b   : > { %v1372_v34 = vadd.f32 %v1316_v37, %v1176_v49  ;;  %370 = vmatmul.f32.gmra.mxu0 %v3157_v54  ;;  %1271 = vmatmul.f32.gmra.mxu3 %v1090_v28  ;;  %v1179_v56 = vpop.f32.mrf.mxu2 }
 0x12c   : > { %944 = vst.msk [vmem:[#allocation2 + $0x78] sm:$0xff] %vm443_vm0, %v888_v7  ;;  %v3317_v58 = vld [vmem:[#allocation2 + $0x68] sm:$0xff] }
 0x12d   : > { %1428 = vst.msk [vmem:[#allocation2 + $0x70] sm:$0xff] %vm443_vm0, %v1372_v34  ;;  %v1928_v0 = vrot.slane %v3317_v58, 2  ;;  %v1605_v13 = vrot.slane %v3317_v58, 1  ;;  %744 = vmatmul.f32.gmra.mxu1 %v3245_v18 }
 0x12e   : > { %v781_v54 = vpop.f32.mrf.mxu3 }
 0x12f   : > { %v917_v55 = vadd.f32 %v861_v5, %v781_v54  ;;  %v1929_v43 = vsel %vm1905_vm1, %v1927_v62, %v1928_v0  ;;  %v1606_v29 = vsel %vm1582_vm2, %v1604_v3, %v1605_v13 }
 0x130   : > { %2028 = vrot.lane.b32.xlu2 %v1929_v43, %s2564_s6  ;;  %1705 = vrot.lane.b32.xlu0 %v1606_v29, %s2565_s7  ;;  %v326_v45 = vpop.f32.mrf.mxu0 }
 0x131   : > { %973 = vst.msk [vmem:[#allocation2 + $0x160] sm:$0xff] %vm443_vm0, %v917_v55  ;;  %v833_v20 = vld [vmem:[#allocation2 + $0x80] sm:$0xff]  ;;  %1229 = vmatmul.f32.gmra.mxu2 %v3320_v63 }
 0x132   : > { %v889_v9 = vadd.f32 %v833_v20, %v697_v46  ;;  %461 = vst.msk [vmem:[#allocation2 + $0x88] sm:$0xff] %vm443_vm0, %v326_v45  ;;  %v700_v26 = vpop.f32.mrf.mxu1  ;;  %v3358_v46 = vld [vmem:[%s2759_s30 + $0x150] sm:$0xff]  ;;  %v3383_v45 = vld [vmem:[%s2759_s30 + $0x158] sm:$0xff] }
 0x133   : > { %v1317_v42 = vld [vmem:[#allocation2 + $0x78] sm:$0xff]  ;;  %373 = vmatmul.f32.gmra.mxu0 %v3189_v21  ;;  %1274 = vmatmul.f32.gmra.mxu3 %v1091_v41  ;;  %v1182_v31 = vpop.f32.mrf.mxu2 }
 0x134   : > { %945 = vst.msk [vmem:[#allocation2 + $0x80] sm:$0xff] %vm443_vm0, %v889_v9  ;;  %v1373_v47 = vadd.f32 %v1317_v42, %v1179_v56  ;;  %v3338_v49 = vld [vmem:[#allocation2 + $0x70] sm:$0xff] }
 0x135   : > { %v1930_v30 = vrot.slane %v3338_v49, 2  ;;  %v1607_v6 = vrot.slane %v3338_v49, 1  ;;  %747 = vmatmul.f32.gmra.mxu1 %v3270_v38 }
 0x136   : > { %1429 = vst.msk [vmem:[#allocation2 + $0x78] sm:$0xff] %vm443_vm0, %v1373_v47  ;;  %v784_v21 = vpop.f32.mrf.mxu3 }
 0x137   : > { %v918_v10 = vadd.f32 %v862_v8, %v784_v21  ;;  %v1931_v28 = vsel %vm1905_vm1, %v1928_v0, %v1930_v30  ;;  %v1608_v24 = vsel %vm1582_vm2, %v1605_v13, %v1607_v6  ;;  %v1078_v0 = vmax.f32 %v3358_v46, 0.0 }
 0x138   : > { %2030 = vrot.lane.b32.xlu0 %v1931_v28, %s2564_s6  ;;  %1707 = vrot.lane.b32.xlu1 %v1608_v24, %s2565_s7  ;;  %v329_v22 = vpop.f32.mrf.mxu0  ;;  %v3409_v28 = vld [vmem:[%s2759_s30 + $0x160] sm:$0xff] }
 0x139   : > { %974 = vst.msk [vmem:[#allocation2 + $0x168] sm:$0xff] %vm443_vm0, %v918_v10  ;;  %v834_v39 = vld [vmem:[#allocation2 + $0x88] sm:$0xff]  ;;  %1232 = vmatmul.f32.gmra.mxu2 %v3343_v33 }
 0x13a   : > { %v890_v7 = vadd.f32 %v834_v39, %v700_v26  ;;  %462 = vst.msk [vmem:[#allocation2 + $0x90] sm:$0xff] %vm443_vm0, %v329_v22  ;;  %v703_v37 = vpop.f32.mrf.mxu1 }
 0x13b   : > { %v1318_v34 = vld [vmem:[#allocation2 + $0x80] sm:$0xff]  ;;  %376 = vmatmul.f32.gmra.mxu0 %v3213_v59  ;;  %1277 = vmatmul.f32.gmra.mxu3 %v611_v51  ;;  %v1185_v56 = vpop.f32.mrf.mxu2  ;;  %v863_v59 = vld [vmem:[#allocation2 + $0x170] sm:$0xff] }
 0x13c   : > { %946 = vst.msk [vmem:[#allocation2 + $0x88] sm:$0xff] %vm443_vm0, %v890_v7  ;;  %v1374_v60 = vadd.f32 %v1318_v34, %v1182_v31  ;;  %v1080_v34 = vmax.f32 %v3409_v28, 0.0 }
 0x13d   : > { %v3364_v62 = vld [vmem:[#allocation2 + $0x78] sm:$0xff]  ;;  %750 = vmatmul.f32.gmra.mxu1 %v3290_v11 }
 0x13e   : > { %1430 = vst.msk [vmem:[#allocation2 + $0x80] sm:$0xff] %vm443_vm0, %v1374_v60  ;;  %v787_v3 = vpop.f32.mrf.mxu3  ;;  %v1932_v19 = vrot.slane %v3364_v62, 2  ;;  %v1609_v51 = vrot.slane %v3364_v62, 1 }
 0x13f   : > { %v919_v13 = vadd.f32 %v863_v59, %v787_v3 }
 0x140   : > { %2034 = vrot.lane.b32.xlu2 %v1932_v19, %s2564_s6  ;;  %v1933_v54 = vsel %vm1905_vm1, %v1930_v30, %v1932_v19  ;;  %1711 = vrot.lane.b32.xlu0 %v1609_v51, %s2565_s7  ;;  %v332_v5 = vpop.f32.mrf.mxu0  ;;  %v1610_v47 = vsel %vm1582_vm2, %v1607_v6, %v1609_v51 }
 0x141   : > { %975 = vst.msk [vmem:[#allocation2 + $0x170] sm:$0xff] %vm443_vm0, %v919_v13  ;;  %v835_v55 = vld [vmem:[#allocation2 + $0x90] sm:$0xff]  ;;  %2032 = vrot.lane.b32.xlu1 %v1933_v54, %s2564_s6  ;;  %1235 = vmatmul.f32.gmra.mxu2 %v1078_v0 }
 0x142   : > { %v891_v43 = vadd.f32 %v835_v55, %v703_v37  ;;  %463 = vst.msk [vmem:[#allocation2 + $0x98] sm:$0xff] %vm443_vm0, %v332_v5  ;;  %v1682_v29 = vpop.permute.xlu0 %1681  ;;  %v706_v41 = vpop.f32.mrf.mxu1 }
 0x143   : > { %v1319_v20 = vld [vmem:[#allocation2 + $0x88] sm:$0xff]  ;;  %v1849_v9 = vadd.f32 %v1682_v29, %v3067_v36  ;;  %379 = vmatmul.f32.gmra.mxu0 %v3230_v61  ;;  %1280 = vmatmul.f32.gmra.mxu3 %v612_v2  ;;  %v1188_v26 = vpop.f32.mrf.mxu2  ;;  %v1079_v36 = vmax.f32 %v3383_v45, 0.0  ;;  %v864_v2 = vld [vmem:[#allocation2 + $0x178] sm:$0xff] }
 0x144   : > { %947 = vst.msk [vmem:[#allocation2 + $0x90] sm:$0xff] %vm443_vm0, %v891_v43  ;;  %v1375_v42 = vadd.f32 %v1319_v20, %v1185_v56 }
 0x145   : > { %v2172_v31 = vadd.f32 %v2005_v27, %v1849_v9  ;;  %753 = vmatmul.f32.gmra.mxu1 %v3305_v32  ;;  %v3414_v22 = vld [vmem:[#allocation2 + $0x80] sm:$0xff]  ;;  %v3440_v27 = vld [vmem:[%s2759_s30 + $0x168] sm:$0xff] }
 0x146   : > { %1431 = vst.msk [vmem:[#allocation2 + $0x88] sm:$0xff] %vm443_vm0, %v1375_v42  ;;  %v790_v52 = vpop.f32.mrf.mxu3  ;;  %v1934_v17 = vrot.slane %v3414_v22, 2  ;;  %v1611_v60 = vrot.slane %v3414_v22, 1 }
 0x147   : > { %2229 = vst.msk [vmem:[%s3393_s13] sm:$0xff] %vm2228_vm3, %v2172_v31  ;;  %v920_v61 = vadd.f32 %v864_v2, %v790_v52  ;;  %v2475_v52 = vld [vmem:[%s2759_s30 + $0x1e0] sm:$0xff] }
 0x148   : > { %1709 = vrot.lane.b32.xlu2 %v1610_v47, %s2565_s7  ;;  %v335_v30 = vpop.f32.mrf.mxu0  ;;  %v1081_v47 = vmax.f32 %v3440_v27, 0.0 }
 0x149   : > { %976 = vst.msk [vmem:[#allocation2 + $0x178] sm:$0xff] %vm443_vm0, %v920_v61  ;;  %v836_v21 = vld [vmem:[#allocation2 + $0x98] sm:$0xff]  ;;  %1238 = vmatmul.f32.gmra.mxu2 %v1079_v36 }
 0x14a   : > { %464 = vst.msk [vmem:[#allocation2 + $0xa0] sm:$0xff] %vm443_vm0, %v335_v30  ;;  %v892_v8 = vadd.f32 %v836_v21, %v706_v41  ;;  %v1684_v10 = vpop.permute.xlu0 %1683  ;;  %v709_v6 = vpop.f32.mrf.mxu1  ;;  %v1096_v21 = vmax.f32 %v2475_v52, 0.0 }
 0x14b   : > { %v1320_v24 = vld [vmem:[#allocation2 + $0x90] sm:$0xff]  ;;  %382 = vmatmul.f32.gmra.mxu0 %v3245_v18  ;;  %1283 = vmatmul.f32.gmra.mxu3 %v613_v57  ;;  %v1191_v39 = vpop.f32.mrf.mxu2  ;;  %v865_v18 = vld [vmem:[#allocation2 + $0x180] sm:$0xff]  ;;  %v1850_v54 = vadd.f32 %v1684_v10, %v3072_v40  ;;  %v2011_v40 = vpop.permute.xlu2 %2010 }
 0x14c   : > { %948 = vst.msk [vmem:[#allocation2 + $0x98] sm:$0xff] %vm443_vm0, %v892_v8  ;;  %v1376_v7 = vadd.f32 %v1320_v24, %v1188_v26 }
 0x14d   : > { %v3417_v37 = vld [vmem:[#allocation2 + $0x88] sm:$0xff]  ;;  %756 = vmatmul.f32.gmra.mxu1 %v3320_v63 }
 0x14e   : > { %1432 = vst.msk [vmem:[#allocation2 + $0x90] sm:$0xff] %vm443_vm0, %v1376_v7  ;;  %v793_v56 = vpop.f32.mrf.mxu3  ;;  %v1935_v57 = vrot.slane %v3417_v37, 2  ;;  %v1612_v3 = vrot.slane %v3417_v37, 1 }
 0x14f   : > { %v921_v59 = vadd.f32 %v865_v18, %v793_v56 }
 0x150   : > { %v1936_v19 = vsel %vm1905_vm1, %v1934_v17, %v1935_v57  ;;  %v1613_v51 = vsel %vm1582_vm2, %v1611_v60, %v1612_v3  ;;  %v338_v13 = vpop.f32.mrf.mxu0  ;;  %v2461_v17 = vld [vmem:[%s2759_s30 + $0x170] sm:$0xff] }
 0x151   : > { %977 = vst.msk [vmem:[#allocation2 + $0x180] sm:$0xff] %vm443_vm0, %v921_v59  ;;  %v837_v5 = vld [vmem:[#allocation2 + $0xa0] sm:$0xff]  ;;  %2036 = vrot.lane.b32.xlu0 %v1936_v19, %s2564_s6  ;;  %1713 = vrot.lane.b32.xlu1 %v1613_v51, %s2565_s7  ;;  %v1688_v55 = vpop.permute.xlu1 %1687  ;;  %v2476_v59 = vld [vmem:[%s2759_s30 + $0x1e8] sm:$0xff]  ;;  %v867_v51 = vld [vmem:[#allocation2 + $0x190] sm:$0xff] }
 0x152   : > { %v893_v43 = vadd.f32 %v837_v5, %v709_v6  ;;  %465 = vst.msk [vmem:[#allocation2 + $0xa8] sm:$0xff] %vm443_vm0, %v338_v13  ;;  %v1852_v29 = vadd.f32 %v1688_v55, %v3112_v23  ;;  %v2007_v41 = vpop.permute.xlu0 %2006  ;;  %1241 = vmatmul.f32.gmra.mxu2 %v1080_v34  ;;  %v712_v26 = vpop.f32.mrf.mxu1 }
 0x153   : > { %v1321_v20 = vld [vmem:[#allocation2 + $0x98] sm:$0xff]  ;;  %v2173_v9 = vadd.f32 %v2007_v41, %v1850_v54  ;;  %385 = vmatmul.f32.gmra.mxu0 %v3270_v38  ;;  %1286 = vmatmul.f32.gmra.mxu3 %v614_v35  ;;  %v1082_v54 = vmax.f32 %v2461_v17, 0.0 }
 0x154   : > { %949 = vst.msk [vmem:[#allocation2 + $0xa0] sm:$0xff] %vm443_vm0, %v893_v43  ;;  %v2175_v23 = vadd.f32 %v2011_v40, %v1852_v29  ;;  %v1377_v42 = vadd.f32 %v1321_v20, %v1191_v39  ;;  %v1194_v31 = vpop.f32.mrf.mxu2  ;;  %v1097_v43 = vmax.f32 %v2476_v59, 0.0 }
 0x155   : > { %2230 = vst.msk [vmem:[%s3393_s13 + $0x8] sm:$0xff] %vm2228_vm3, %v2173_v9  ;;  %v3446_v2 = vld [vmem:[#allocation2 + $0x90] sm:$0xff]  ;;  %759 = vmatmul.f32.gmra.mxu1 %v3343_v33 }
 0x156   : > { %2233 = vst.msk [vmem:[%s3393_s13 + $0x18] sm:$0xf] %vm2232_vm4, %v2175_v23  ;;  %v796_v38 = vpop.f32.mrf.mxu3  ;;  %v1937_v35 = vrot.slane %v3446_v2, 2  ;;  %v1614_v61 = vrot.slane %v3446_v2, 1 }
 0x157   : > { %1433 = vst.msk [vmem:[#allocation2 + $0x98] sm:$0xff] %vm443_vm0, %v1377_v42  ;;  %v922_v30 = vadd.f32 %v866_v25, %v796_v38  ;;  %v2477_v25 = vld [vmem:[%s2759_s30 + $0x1f0] sm:$0xff] }
 0x158   : > { %v1938_v8 = vsel %vm1905_vm1, %v1935_v57, %v1937_v35  ;;  %v1615_v10 = vsel %vm1582_vm2, %v1612_v3, %v1614_v61  ;;  %v341_v24 = vpop.f32.mrf.mxu0  ;;  %v1690_v57 = vpop.permute.xlu2 %1689 }
 0x159   : > { %978 = vst.msk [vmem:[#allocation2 + $0x188] sm:$0xff] %vm443_vm0, %v922_v30  ;;  %v838_v6 = vld [vmem:[#allocation2 + $0xa8] sm:$0xff]  ;;  %2038 = vrot.lane.b32.xlu1 %v1938_v8, %s2564_s6  ;;  %1715 = vrot.lane.b32.xlu2 %v1615_v10, %s2565_s7  ;;  %v1686_v39 = vpop.permute.xlu1 %1685  ;;  %v1853_v40 = vadd.f32 %v1690_v57, %v3146_v44  ;;  %v1098_v10 = vmax.f32 %v2477_v25, 0.0 }
 0x15a   : > { %v894_v7 = vadd.f32 %v838_v6, %v712_v26  ;;  %466 = vst.msk [vmem:[#allocation2 + $0xb0] sm:$0xff] %vm443_vm0, %v341_v24  ;;  %1244 = vmatmul.f32.gmra.mxu2 %v1081_v47  ;;  %v715_v18 = vpop.f32.mrf.mxu1  ;;  %v1851_v29 = vadd.f32 %v1686_v39, %v3094_v4 }
 0x15b   : > { %v1322_v56 = vld [vmem:[#allocation2 + $0xa0] sm:$0xff]  ;;  %388 = vmatmul.f32.gmra.mxu0 %v3290_v11  ;;  %1289 = vmatmul.f32.gmra.mxu3 %v1096_v21  ;;  %v868_v21 = vld [vmem:[#allocation2 + $0x198] sm:$0xff] }
 0x15c   : > { %950 = vst.msk [vmem:[#allocation2 + $0xa8] sm:$0xff] %vm443_vm0, %v894_v7  ;;  %v1378_v60 = vadd.f32 %v1322_v56, %v1194_v31  ;;  %v1197_v3 = vpop.f32.mrf.mxu2  ;;  %v2462_v31 = vld [vmem:[%s2759_s30 + $0x178] sm:$0xff]  ;;  %v2463_v56 = vld [vmem:[%s2759_s30 + $0x180] sm:$0xff] }
 0x15d   : > { %762 = vmatmul.f32.gmra.mxu1 %v1078_v0 }
 0x15e   : > { %1434 = vst.msk [vmem:[#allocation2 + $0xa0] sm:$0xff] %vm443_vm0, %v1378_v60  ;;  %v799_v19 = vpop.f32.mrf.mxu3  ;;  %v3472_v13 = vld [vmem:[#allocation2 + $0x98] sm:$0xff] }
 0x15f   : > { %v923_v11 = vadd.f32 %v867_v51, %v799_v19  ;;  %v1939_v5 = vrot.slane %v3472_v13, 2  ;;  %v1616_v55 = vrot.slane %v3472_v13, 1  ;;  %v1084_v19 = vmax.f32 %v2463_v56, 0.0  ;;  %v869_v51 = vld [vmem:[#allocation2 + $0x1a0] sm:$0xff] }
 0x160   : > { %v344_v41 = vpop.f32.mrf.mxu0 }
 0x161   : > { %979 = vst.msk [vmem:[#allocation2 + $0x190] sm:$0xff] %vm443_vm0, %v923_v11  ;;  %2042 = vrot.lane.b32.xlu0 %v1939_v5, %s2564_s6  ;;  %v839_v46 = vld [vmem:[#allocation2 + $0xb0] sm:$0xff]  ;;  %v1940_v0 = vsel %vm1905_vm1, %v1937_v35, %v1939_v5  ;;  %1719 = vrot.lane.b32.xlu1 %v1616_v55, %s2565_s7  ;;  %v2009_v20 = vpop.permute.xlu1 %2008  ;;  %v1692_v35 = vpop.permute.xlu2 %1691  ;;  %v1617_v24 = vsel %vm1582_vm2, %v1614_v61, %v1616_v55 }
 0x162   : > { %v895_v9 = vadd.f32 %v839_v46, %v715_v18  ;;  %2040 = vrot.lane.b32.xlu2 %v1940_v0, %s2564_s6  ;;  %467 = vst.msk [vmem:[#allocation2 + $0xb8] sm:$0xff] %vm443_vm0, %v344_v41  ;;  %v2174_v4 = vadd.f32 %v2009_v20, %v1851_v29  ;;  %v2013_v44 = vpop.permute.xlu0 %2012  ;;  %1247 = vmatmul.f32.gmra.mxu2 %v1082_v54  ;;  %v718_v42 = vpop.f32.mrf.mxu1 }
 0x163   : > { %v1323_v26 = vld [vmem:[#allocation2 + $0xa8] sm:$0xff]  ;;  %v2176_v23 = vadd.f32 %v2013_v44, %v1853_v40  ;;  %391 = vmatmul.f32.gmra.mxu0 %v3305_v32  ;;  %1292 = vmatmul.f32.gmra.mxu3 %v1097_v43  ;;  %v1083_v32 = vmax.f32 %v2462_v31, 0.0  ;;  %v1854_v39 = vadd.f32 %v1692_v35, %v3152_v50 }
 0x164   : > { %951 = vst.msk [vmem:[#allocation2 + $0xb0] sm:$0xff] %vm443_vm0, %v895_v9  ;;  %v1379_v52 = vadd.f32 %v1323_v26, %v1197_v3  ;;  %v1200_v38 = vpop.f32.mrf.mxu2  ;;  %v2478_v3 = vld [vmem:[%s2759_s30 + $0x1f8] sm:$0xff] }
 0x165   : > { %2231 = vst.msk [vmem:[%s3393_s13 + $0x10] sm:$0xff] %vm2228_vm3, %v2174_v4  ;;  %765 = vmatmul.f32.gmra.mxu1 %v1079_v36  ;;  %v3504_v50 = vld [vmem:[#allocation2 + $0xa0] sm:$0xff]  ;;  %v1099_v29 = vmax.f32 %v2478_v3, 0.0 }
 0x166   : > { %1435 = vst.msk [vmem:[#allocation2 + $0xa8] sm:$0xff] %vm443_vm0, %v1379_v52  ;;  %v802_v30 = vpop.f32.mrf.mxu3  ;;  %v1941_v54 = vrot.slane %v3504_v50, 2  ;;  %v1618_v5 = vrot.slane %v3504_v50, 1 }
 0x167   : > { %2234 = vst.msk [vmem:[%s3393_s13 + $0x20] sm:$0xff] %vm2228_vm3, %v2176_v23  ;;  %v924_v8 = vadd.f32 %v868_v21, %v802_v30  ;;  %v2464_v23 = vld [vmem:[%s2759_s30 + $0x188] sm:$0xff] }
 0x168   : > { %v347_v6 = vpop.f32.mrf.mxu0  ;;  %v1085_v30 = vmax.f32 %v2464_v23, 0.0 }
 0x169   : > { %980 = vst.msk [vmem:[#allocation2 + $0x198] sm:$0xff] %vm443_vm0, %v924_v8  ;;  %1717 = vrot.lane.b32.xlu0 %v1617_v24, %s2565_s7  ;;  %v840_v45 = vld [vmem:[#allocation2 + $0xb8] sm:$0xff]  ;;  %v2017_v40 = vpop.permute.xlu2 %2016 }
 0x16a   : > { %468 = vst.msk [vmem:[#allocation2 + $0xc0] sm:$0xff] %vm443_vm0, %v347_v6  ;;  %v896_v36 = vadd.f32 %v840_v45, %v718_v42  ;;  %v2015_v7 = vpop.permute.xlu1 %2014  ;;  %1250 = vmatmul.f32.gmra.mxu2 %v1083_v32  ;;  %v721_v61 = vpop.f32.mrf.mxu1 }
 0x16b   : > { %v1324_v18 = vld [vmem:[#allocation2 + $0xb0] sm:$0xff]  ;;  %v2177_v17 = vadd.f32 %v2015_v7, %v1854_v39  ;;  %394 = vmatmul.f32.gmra.mxu0 %v3320_v63  ;;  %1295 = vmatmul.f32.gmra.mxu3 %v1098_v10 }
 0x16c   : > { %952 = vst.msk [vmem:[#allocation2 + $0xb8] sm:$0xff] %vm443_vm0, %v896_v36  ;;  %v1380_v57 = vadd.f32 %v1324_v18, %v1200_v38  ;;  %v1203_v60 = vpop.f32.mrf.mxu2 }
 0x16d   : > { %2235 = vst.msk [vmem:[%s3393_s13 + $0x28] sm:$0xff] %vm2228_vm3, %v2177_v17  ;;  %v3510_v59 = vld [vmem:[#allocation2 + $0xa8] sm:$0xff]  ;;  %768 = vmatmul.f32.gmra.mxu1 %v1080_v34 }
 0x16e   : > { %1436 = vst.msk [vmem:[#allocation2 + $0xb0] sm:$0xff] %vm443_vm0, %v1380_v57  ;;  %v805_v63 = vpop.f32.mrf.mxu3  ;;  %v1942_v11 = vrot.slane %v3510_v59, 2  ;;  %v1619_v55 = vrot.slane %v3510_v59, 1  ;;  %v871_v57 = vld [vmem:[#allocation2 + $0x1b0] sm:$0xff] }
 0x16f   : > { %v925_v43 = vadd.f32 %v869_v51, %v805_v63 }
 0x170   : > { %v1943_v41 = vsel %vm1905_vm1, %v1941_v54, %v1942_v11  ;;  %v1620_v28 = vsel %vm1582_vm2, %v1618_v5, %v1619_v55  ;;  %v350_v34 = vpop.f32.mrf.mxu0 }
 0x171   : > { %981 = vst.msk [vmem:[#allocation2 + $0x1a0] sm:$0xff] %vm443_vm0, %v925_v43  ;;  %v841_v46 = vld [vmem:[#allocation2 + $0xc0] sm:$0xff]  ;;  %2044 = vrot.lane.b32.xlu1 %v1943_v41, %s2564_s6  ;;  %1721 = vrot.lane.b32.xlu2 %v1620_v28, %s2565_s7  ;;  %v2019_v0 = vpop.permute.xlu0 %2018  ;;  %v1698_v24 = vpop.permute.xlu2 %1697 }
 0x172   : > { %v897_v20 = vadd.f32 %v841_v46, %v721_v61  ;;  %469 = vst.msk [vmem:[#allocation2 + $0xc8] sm:$0xff] %vm443_vm0, %v350_v34  ;;  %v1696_v9 = vpop.permute.xlu1 %1695  ;;  %1253 = vmatmul.f32.gmra.mxu2 %v1084_v19  ;;  %v724_v26 = vpop.f32.mrf.mxu1  ;;  %v1857_v51 = vadd.f32 %v1698_v24, %v3238_v12 }
 0x173   : > { %v1325_v4 = vld [vmem:[#allocation2 + $0xb8] sm:$0xff]  ;;  %v1856_v44 = vadd.f32 %v1696_v9, %v3204_v16  ;;  %397 = vmatmul.f32.gmra.mxu0 %v3343_v33  ;;  %1298 = vmatmul.f32.gmra.mxu3 %v1099_v29  ;;  %v870_v16 = vld [vmem:[#allocation2 + $0x1a8] sm:$0xff] }
 0x174   : > { %953 = vst.msk [vmem:[#allocation2 + $0xc0] sm:$0xff] %vm443_vm0, %v897_v20  ;;  %v1381_v42 = vadd.f32 %v1325_v4, %v1203_v60  ;;  %v1206_v31 = vpop.f32.mrf.mxu2 }
 0x175   : > { %v2179_v52 = vadd.f32 %v2019_v0, %v1856_v44  ;;  %v3529_v38 = vld [vmem:[#allocation2 + $0xb0] sm:$0xff]  ;;  %771 = vmatmul.f32.gmra.mxu1 %v1081_v47 }
 0x176   : > { %1437 = vst.msk [vmem:[#allocation2 + $0xb8] sm:$0xff] %vm443_vm0, %v1381_v42  ;;  %v808_v25 = vpop.f32.mrf.mxu3  ;;  %v1944_v33 = vrot.slane %v3529_v38, 2  ;;  %v1621_v35 = vrot.slane %v3529_v38, 1 }
 0x177   : > { %2237 = vst.msk [vmem:[%s3393_s13 + $0x38] sm:$0xf] %vm2232_vm4, %v2179_v52  ;;  %v926_v21 = vadd.f32 %v870_v16, %v808_v25 }
 0x178   : > { %v1945_v32 = vsel %vm1905_vm1, %v1942_v11, %v1944_v33  ;;  %v1622_v8 = vsel %vm1582_vm2, %v1619_v55, %v1621_v35  ;;  %v353_v10 = vpop.f32.mrf.mxu0 }
 0x179   : > { %982 = vst.msk [vmem:[#allocation2 + $0x1a8] sm:$0xff] %vm443_vm0, %v926_v21  ;;  %v842_v27 = vld [vmem:[#allocation2 + $0xc8] sm:$0xff]  ;;  %2046 = vrot.lane.b32.xlu2 %v1945_v32, %s2564_s6  ;;  %1723 = vrot.lane.b32.xlu0 %v1622_v8, %s2565_s7  ;;  %v1694_v47 = vpop.permute.xlu0 %1693  ;;  %v2023_v55 = vpop.permute.xlu2 %2022  ;;  %v1344_v21 = vld [vmem:[#allocation2 + $0x150] sm:$0xff] }
 0x17a   : > { %v898_v6 = vadd.f32 %v842_v27, %v724_v26  ;;  %470 = vst.msk [vmem:[#allocation2 + $0xd0] sm:$0xff] %vm443_vm0, %v353_v10  ;;  %v1855_v39 = vadd.f32 %v1694_v47, %v3180_v15  ;;  %1256 = vmatmul.f32.gmra.mxu2 %v1085_v30  ;;  %v727_v36 = vpop.f32.mrf.mxu1 }
 0x17b   : > { %v1326_v45 = vld [vmem:[#allocation2 + $0xc0] sm:$0xff] }
 0x17c   : > { %954 = vst.msk [vmem:[#allocation2 + $0xc8] sm:$0xff] %vm443_vm0, %v898_v6  ;;  %v2178_v7 = vadd.f32 %v2017_v40, %v1855_v39  ;;  %v1382_v56 = vadd.f32 %v1326_v45, %v1206_v31  ;;  %v1209_v18 = vpop.f32.mrf.mxu2  ;;  %v872_v40 = vld [vmem:[#allocation2 + $0x1b8] sm:$0xff] }
 0x17d   : > { %v3546_v17 = vld [vmem:[#allocation2 + $0xb8] sm:$0xff] }
 0x17e   : > { %2236 = vst.msk [vmem:[%s3393_s13 + $0x30] sm:$0xff] %vm2228_vm3, %v2178_v7  ;;  %v811_v61 = vpop.f32.mrf.mxu3  ;;  %v1946_v60 = vrot.slane %v3546_v17, 2  ;;  %v1623_v3 = vrot.slane %v3546_v17, 1 }
 0x17f   : > { %1438 = vst.msk [vmem:[#allocation2 + $0xc0] sm:$0xff] %vm443_vm0, %v1382_v56  ;;  %v927_v15 = vadd.f32 %v871_v57, %v811_v61 }
 0x180   : > { %2050 = vrot.lane.b32.xlu1 %v1946_v60, %s2564_s6  ;;  %v1947_v19 = vsel %vm1905_vm1, %v1944_v33, %v1946_v60  ;;  %v356_v63 = vpop.f32.mrf.mxu0  ;;  %v1624_v0 = vsel %vm1582_vm2, %v1621_v35, %v1623_v3 }
 0x181   : > { %983 = vst.msk [vmem:[#allocation2 + $0x1b0] sm:$0xff] %vm443_vm0, %v927_v15  ;;  %v843_v54 = vld [vmem:[#allocation2 + $0xd0] sm:$0xff]  ;;  %2048 = vrot.lane.b32.xlu0 %v1947_v19, %s2564_s6  ;;  %1727 = vrot.lane.b32.xlu2 %v1623_v3, %s2565_s7  ;;  %v1704_v16 = vpop.permute.xlu2 %1703  ;;  %v1345_v15 = vld [vmem:[#allocation2 + $0x158] sm:$0xff] }
 0x182   : > { %v899_v11 = vadd.f32 %v843_v54, %v727_v36  ;;  %471 = vst.msk [vmem:[#allocation2 + $0xd8] sm:$0xff] %vm443_vm0, %v356_v63  ;;  %v2021_v5 = vpop.permute.xlu1 %2020  ;;  %v730_v41 = vpop.f32.mrf.mxu1  ;;  %v1860_v27 = vadd.f32 %v1704_v16, %v3283_v1 }
 0x183   : > { %v1327_v43 = vld [vmem:[#allocation2 + $0xc8] sm:$0xff]  ;;  %v2180_v29 = vadd.f32 %v2021_v5, %v1857_v51 }
 0x184   : > { %955 = vst.msk [vmem:[#allocation2 + $0xd0] sm:$0xff] %vm443_vm0, %v899_v11  ;;  %v1383_v28 = vadd.f32 %v1327_v43, %v1209_v18  ;;  %v1212_v34 = vpop.f32.mrf.mxu2 }
 0x185   : > { %2238 = vst.msk [vmem:[%s3393_s13 + $0x40] sm:$0xff] %vm2228_vm3, %v2180_v29 }
 0x186   : > { %1439 = vst.msk [vmem:[#allocation2 + $0xc8] sm:$0xff] %vm443_vm0, %v1383_v28  ;;  %v814_v12 = vpop.f32.mrf.mxu3  ;;  %v3569_v31 = vld [vmem:[#allocation2 + $0xc0] sm:$0xff] }
 0x187   : > { %v928_v46 = vadd.f32 %v872_v40, %v814_v12  ;;  %v1948_v32 = vrot.slane %v3569_v31, 2  ;;  %v1625_v8 = vrot.slane %v3569_v31, 1 }
 0x188   : > { %1725 = vrot.lane.b32.xlu1 %v1624_v0, %s2565_s7  ;;  %v359_v20 = vpop.f32.mrf.mxu0 }
 0x189   : > { %984 = vst.msk [vmem:[#allocation2 + $0x1b8] sm:$0xff] %vm443_vm0, %v928_v46  ;;  %v844_v9 = vld [vmem:[#allocation2 + $0xd8] sm:$0xff] }
 0x18a   : > { %472 = vst.msk [vmem:[#allocation2 + $0xe0] sm:$0xff] %vm443_vm0, %v359_v20  ;;  %v900_v4 = vadd.f32 %v844_v9, %v730_v41  ;;  %v1700_v44 = vpop.permute.xlu0 %1699  ;;  %v733_v42 = vpop.f32.mrf.mxu1 }
 0x18b   : > { %v1328_v26 = vld [vmem:[#allocation2 + $0xd0] sm:$0xff]  ;;  %v1858_v23 = vadd.f32 %v1700_v44, %v3243_v14  ;;  %v2029_v20 = vpop.permute.xlu2 %2028  ;;  %v1346_v44 = vld [vmem:[#allocation2 + $0x160] sm:$0xff] }
 0x18c   : > { %956 = vst.msk [vmem:[#allocation2 + $0xd8] sm:$0xff] %vm443_vm0, %v900_v4  ;;  %v1384_v52 = vadd.f32 %v1328_v26, %v1212_v34  ;;  %v1215_v25 = vpop.f32.mrf.mxu2 }
 0x18d   : > { %v2181_v33 = vadd.f32 %v2023_v55, %v1858_v23  ;;  %v3572_v35 = vld [vmem:[#allocation2 + $0xc8] sm:$0xff] }
 0x18e   : > { %1440 = vst.msk [vmem:[#allocation2 + $0xd0] sm:$0xff] %vm443_vm0, %v1384_v52  ;;  %v1260_v30 = vpop.f32.mrf.mxu3  ;;  %v1949_v14 = vrot.slane %v3572_v35, 2  ;;  %v1626_v10 = vrot.slane %v3572_v35, 1 }
 0x18f   : > { %2239 = vst.msk [vmem:[%s3393_s13 + $0x48] sm:$0xff] %vm2228_vm3, %v2181_v33  ;;  %v1400_v24 = vadd.f32 %v1344_v21, %v1260_v30 }
 0x190   : > { %v1950_v47 = vsel %vm1905_vm1, %v1948_v32, %v1949_v14  ;;  %v1627_v6 = vsel %vm1582_vm2, %v1625_v8, %v1626_v10  ;;  %v362_v39 = vpop.f32.mrf.mxu0 }
 0x191   : > { %1456 = vst.msk [vmem:[#allocation2 + $0x150] sm:$0xff] %vm443_vm0, %v1400_v24  ;;  %v845_v45 = vld [vmem:[#allocation2 + $0xe0] sm:$0xff]  ;;  %2052 = vrot.lane.b32.xlu2 %v1950_v47, %s2564_s6  ;;  %1729 = vrot.lane.b32.xlu0 %v1627_v6, %s2565_s7  ;;  %v2027_v36 = vpop.permute.xlu1 %2026  ;;  %v1347_v6 = vld [vmem:[#allocation2 + $0x168] sm:$0xff] }
 0x192   : > { %v901_v7 = vadd.f32 %v845_v45, %v733_v42  ;;  %473 = vst.msk [vmem:[#allocation2 + $0xe8] sm:$0xff] %vm443_vm0, %v362_v39  ;;  %v2183_v56 = vadd.f32 %v2027_v36, %v1860_v27  ;;  %v736_v1 = vpop.f32.mrf.mxu1  ;;  %v2025_v29 = vpop.permute.xlu0 %2024 }
 0x193   : > { %v1329_v18 = vld [vmem:[#allocation2 + $0xd8] sm:$0xff] }
 0x194   : > { %957 = vst.msk [vmem:[#allocation2 + $0xe0] sm:$0xff] %vm443_vm0, %v901_v7  ;;  %v1385_v61 = vadd.f32 %v1329_v18, %v1215_v25  ;;  %v1218_v57 = vpop.f32.mrf.mxu2 }
 0x195   : > { %2241 = vst.msk [vmem:[%s3393_s13 + $0x58] sm:$0xf] %vm2232_vm4, %v2183_v56  ;;  %v3591_v60 = vld [vmem:[#allocation2 + $0xd0] sm:$0xff] }
 0x196   : > { %1441 = vst.msk [vmem:[#allocation2 + $0xd8] sm:$0xff] %vm443_vm0, %v1385_v61  ;;  %v1263_v3 = vpop.f32.mrf.mxu3  ;;  %v1951_v19 = vrot.slane %v3591_v60, 2  ;;  %v1628_v63 = vrot.slane %v3591_v60, 1 }
 0x197   : > { %v1401_v51 = vadd.f32 %v1345_v15, %v1263_v3 }
 0x198   : > { %v1952_v54 = vsel %vm1905_vm1, %v1949_v14, %v1951_v19  ;;  %v1629_v11 = vsel %vm1582_vm2, %v1626_v10, %v1628_v63  ;;  %v365_v5 = vpop.f32.mrf.mxu0 }
 0x199   : > { %1457 = vst.msk [vmem:[#allocation2 + $0x158] sm:$0xff] %vm443_vm0, %v1401_v51  ;;  %v846_v55 = vld [vmem:[#allocation2 + $0xe8] sm:$0xff]  ;;  %2054 = vrot.lane.b32.xlu0 %v1952_v54, %s2564_s6  ;;  %1731 = vrot.lane.b32.xlu1 %v1629_v11, %s2565_s7  ;;  %v1702_v43 = vpop.permute.xlu1 %1701 }
 0x19a   : > { %v902_v41 = vadd.f32 %v846_v55, %v736_v1  ;;  %474 = vst.msk [vmem:[#allocation2 + $0xf0] sm:$0xff] %vm443_vm0, %v365_v5  ;;  %v1859_v28 = vadd.f32 %v1702_v43, %v3264_v53  ;;  %v739_v12 = vpop.f32.mrf.mxu1  ;;  %v3621_v24 = vpop.permute.xlu2 %2034 }
 0x19b   : > { %v1330_v34 = vld [vmem:[#allocation2 + $0xe0] sm:$0xff] }
 0x19c   : > { %958 = vst.msk [vmem:[#allocation2 + $0xe8] sm:$0xff] %vm443_vm0, %v902_v41  ;;  %v2182_v40 = vadd.f32 %v2025_v29, %v1859_v28  ;;  %v1386_v46 = vadd.f32 %v1330_v34, %v1218_v57  ;;  %v1221_v0 = vpop.f32.mrf.mxu2  ;;  %v3634_v57 = vld [vmem:[#allocation2 + $0x150] sm:$0xff] }
 0x19d   : > { %v3604_v9 = vld [vmem:[#allocation2 + $0xd8] sm:$0xff]  ;;  %v1979_v5 = vrot.slane %v3634_v57, 2  ;;  %v1348_v29 = vld [vmem:[#allocation2 + $0x170] sm:$0xff]  ;;  %v1656_v41 = vrot.slane %v3634_v57, 1 }
 0x19e   : > { %2240 = vst.msk [vmem:[%s3393_s13 + $0x50] sm:$0xff] %vm2228_vm3, %v2182_v40  ;;  %v1266_v4 = vpop.f32.mrf.mxu3  ;;  %v1953_v26 = vrot.slane %v3604_v9, 2  ;;  %v1630_v23 = vrot.slane %v3604_v9, 1 }
 0x19f   : > { %1442 = vst.msk [vmem:[#allocation2 + $0xe0] sm:$0xff] %vm443_vm0, %v1386_v46  ;;  %v1402_v53 = vadd.f32 %v1346_v44, %v1266_v4 }
 0x1a0   : > { %2058 = vrot.lane.b32.xlu2 %v1953_v26, %s2564_s6  ;;  %v1954_v42 = vsel %vm1905_vm1, %v1951_v19, %v1953_v26  ;;  %v368_v52 = vpop.f32.mrf.mxu0  ;;  %v3619_v8 = vld [vmem:[#allocation2 + $0x158] sm:$0xff]  ;;  %v1631_v45 = vsel %vm1582_vm2, %v1628_v63, %v1630_v23 }
 0x1a1   : > { %1458 = vst.msk [vmem:[#allocation2 + $0x160] sm:$0xff] %vm443_vm0, %v1402_v53  ;;  %v847_v25 = vld [vmem:[#allocation2 + $0xf0] sm:$0xff]  ;;  %2056 = vrot.lane.b32.xlu1 %v1954_v42, %s2564_s6  ;;  %1735 = vrot.lane.b32.xlu0 %v1630_v23, %s2565_s7  ;;  %v1981_v36 = vrot.slane %v3619_v8, 2 }
 0x1a2   : > { %v903_v16 = vadd.f32 %v847_v25, %v739_v12  ;;  %475 = vst.msk [vmem:[#allocation2 + $0xf8] sm:$0xff] %vm443_vm0, %v368_v52  ;;  %v1706_v33 = vpop.permute.xlu0 %1705  ;;  %v742_v32 = vpop.f32.mrf.mxu1 }
 0x1a3   : > { %v1331_v30 = vld [vmem:[#allocation2 + $0xe8] sm:$0xff]  ;;  %v1861_v21 = vadd.f32 %v1706_v33, %v3313_v48  ;;  %v1658_v48 = vrot.slane %v3619_v8, 1  ;;  %v1710_v34 = vpop.permute.xlu2 %1709  ;;  %v1982_v40 = vsel %vm1905_vm1, %v1979_v5, %v1981_v36 }
 0x1a4   : > { %959 = vst.msk [vmem:[#allocation2 + $0xf0] sm:$0xff] %vm443_vm0, %v903_v16  ;;  %v1387_v14 = vadd.f32 %v1331_v30, %v1221_v0  ;;  %v1224_v10 = vpop.f32.mrf.mxu2  ;;  %v1863_v26 = vadd.f32 %v1710_v34, %v3338_v49  ;;  %v1350_v34 = vld [vmem:[#allocation2 + $0x180] sm:$0xff] }
 0x1a5   : > { %v2184_v27 = vadd.f32 %v2029_v20, %v1861_v21  ;;  %v1659_v46 = vsel %vm1582_vm2, %v1656_v41, %v1658_v48 }
 0x1a6   : > { %1443 = vst.msk [vmem:[#allocation2 + $0xe8] sm:$0xff] %vm443_vm0, %v1387_v14  ;;  %v1269_v47 = vpop.f32.mrf.mxu3  ;;  %v3637_v63 = vld [vmem:[#allocation2 + $0xe0] sm:$0xff] }
 0x1a7   : > { %2242 = vst.msk [vmem:[%s3393_s13 + $0x60] sm:$0xff] %vm2228_vm3, %v2184_v27  ;;  %v1403_v39 = vadd.f32 %v1347_v6, %v1269_v47  ;;  %v1349_v6 = vld [vmem:[#allocation2 + $0x178] sm:$0xff] }
 0x1a8   : > { %1733 = vrot.lane.b32.xlu2 %v1631_v45, %s2565_s7  ;;  %v371_v7 = vpop.f32.mrf.mxu0  ;;  %v3666_v42 = vld [vmem:[#allocation2 + $0x160] sm:$0xff] }
 0x1a9   : > { %1459 = vst.msk [vmem:[#allocation2 + $0x168] sm:$0xff] %vm443_vm0, %v1403_v39  ;;  %v848_v56 = vld [vmem:[#allocation2 + $0xf8] sm:$0xff]  ;;  %1767 = vrot.lane.b32.xlu1 %v1658_v48, %s2565_s7  ;;  %2090 = vrot.lane.b32.xlu0 %v1981_v36, %s2564_s6  ;;  %v1660_v47 = vrot.slane %v3666_v42, 1  ;;  %v1955_v39 = vrot.slane %v3637_v63, 2  ;;  %v1983_v45 = vrot.slane %v3666_v42, 2 }
 0x1aa   : > { %v904_v18 = vadd.f32 %v848_v56, %v742_v32  ;;  %476 = vst.msk [vmem:[#allocation2 + $0x100] sm:$0xff] %vm443_vm0, %v371_v7  ;;  %v2031_v1 = vpop.permute.xlu0 %2030  ;;  %v1708_v61 = vpop.permute.xlu1 %1707 }
 0x1ab   : > { %v1332_v3 = vld [vmem:[#allocation2 + $0xf0] sm:$0xff]  ;;  %v1862_v15 = vadd.f32 %v1708_v61, %v3317_v58  ;;  %v745_v19 = vpop.f32.mrf.mxu1  ;;  %v1632_v58 = vrot.slane %v3637_v63, 1 }
 0x1ac   : > { %960 = vst.msk [vmem:[#allocation2 + $0xf8] sm:$0xff] %vm443_vm0, %v904_v18  ;;  %v1388_v51 = vadd.f32 %v1332_v3, %v1224_v10  ;;  %v1227_v54 = vpop.f32.mrf.mxu2 }
 0x1ad   : > { %v2185_v11 = vadd.f32 %v2031_v1, %v1862_v15  ;;  %v3641_v55 = vld [vmem:[#allocation2 + $0xe8] sm:$0xff] }
 0x1ae   : > { %1444 = vst.msk [vmem:[#allocation2 + $0xf0] sm:$0xff] %vm443_vm0, %v1388_v51  ;;  %v1272_v43 = vpop.f32.mrf.mxu3  ;;  %v1633_v28 = vrot.slane %v3641_v55, 1  ;;  %v1956_v49 = vrot.slane %v3641_v55, 2 }
 0x1af   : > { %2243 = vst.msk [vmem:[%s3393_s13 + $0x68] sm:$0xff] %vm2228_vm3, %v2185_v11  ;;  %v1404_v12 = vadd.f32 %v1348_v29, %v1272_v43 }
 0x1b0   : > { %2088 = vrot.lane.b32.xlu2 %v1982_v40, %s2564_s6  ;;  %v1634_v0 = vsel %vm1582_vm2, %v1632_v58, %v1633_v28  ;;  %v374_v20 = vpop.f32.mrf.mxu0  ;;  %v3659_v4 = vld [vmem:[#allocation2 + $0x168] sm:$0xff] }
 0x1b1   : > { %1460 = vst.msk [vmem:[#allocation2 + $0x170] sm:$0xff] %vm443_vm0, %v1404_v12  ;;  %v849_v44 = vld [vmem:[#allocation2 + $0x100] sm:$0xff]  ;;  %1765 = vrot.lane.b32.xlu0 %v1659_v46, %s2565_s7  ;;  %1737 = vrot.lane.b32.xlu1 %v1634_v0, %s2565_s7  ;;  %v1661_v33 = vrot.slane %v3659_v4, 1  ;;  %v1984_v14 = vrot.slane %v3659_v4, 2 }
 0x1b2   : > { %v905_v23 = vadd.f32 %v849_v44, %v745_v19  ;;  %477 = vst.msk [vmem:[#allocation2 + $0x108] sm:$0xff] %vm443_vm0, %v374_v20  ;;  %v1712_v53 = vpop.permute.xlu0 %1711 }
 0x1b3   : > { %v1333_v52 = vld [vmem:[#allocation2 + $0xf8] sm:$0xff]  ;;  %v2033_v25 = vpop.permute.xlu1 %2032  ;;  %v1864_v16 = vadd.f32 %v1712_v53, %v3364_v62  ;;  %v748_v32 = vpop.f32.mrf.mxu1  ;;  %v1662_v36 = vsel %vm1582_vm2, %v1660_v47, %v1661_v33  ;;  %v1985_v7 = vsel %vm1905_vm1, %v1983_v45, %v1984_v14 }
 0x1b4   : > { %961 = vst.msk [vmem:[#allocation2 + $0x100] sm:$0xff] %vm443_vm0, %v905_v23  ;;  %v1389_v30 = vadd.f32 %v1333_v52, %v1227_v54  ;;  %v2186_v21 = vadd.f32 %v2033_v25, %v1863_v26  ;;  %v1230_v10 = vpop.f32.mrf.mxu2  ;;  %v1716_v52 = vpop.permute.xlu2 %1715 }
 0x1b5   : > { %v2187_v27 = vadd.f32 %v3621_v24, %v1864_v16  ;;  %v1957_v24 = vsel %vm1905_vm1, %v1955_v39, %v1956_v49  ;;  %v3688_v18 = vld [vmem:[#allocation2 + $0xf0] sm:$0xff] }
 0x1b6   : > { %1445 = vst.msk [vmem:[#allocation2 + $0xf8] sm:$0xff] %vm443_vm0, %v1389_v30  ;;  %v1275_v62 = vpop.f32.mrf.mxu3  ;;  %v1635_v19 = vrot.slane %v3688_v18, 1  ;;  %v1958_v43 = vrot.slane %v3688_v18, 2 }
 0x1b7   : > { %2244 = vst.msk [vmem:[%s3393_s13 + $0x70] sm:$0xff] %vm2228_vm3, %v2186_v21  ;;  %v1405_v48 = vadd.f32 %v1349_v6, %v1275_v62 }
 0x1b8   : > { %2245 = vst.msk [vmem:[%s3393_s13 + $0x78] sm:$0xf] %vm2232_vm4, %v2187_v27  ;;  %1769 = vrot.lane.b32.xlu2 %v1662_v36, %s2565_s7  ;;  %v377_v56 = vpop.f32.mrf.mxu0  ;;  %v3693_v61 = vld [vmem:[#allocation2 + $0x170] sm:$0xff]  ;;  %v1636_v40 = vsel %vm1582_vm2, %v1633_v28, %v1635_v19  ;;  %v1959_v0 = vsel %vm1905_vm1, %v1956_v49, %v1958_v43  ;;  %v1351_v27 = vld [vmem:[#allocation2 + $0x188] sm:$0xff] }
 0x1b9   : > { %1461 = vst.msk [vmem:[#allocation2 + $0x178] sm:$0xff] %vm443_vm0, %v1405_v48  ;;  %v850_v1 = vld [vmem:[#allocation2 + $0x108] sm:$0xff]  ;;  %2060 = vrot.lane.b32.xlu0 %v1957_v24, %s2564_s6  ;;  %2092 = vrot.lane.b32.xlu1 %v1985_v7, %s2564_s6  ;;  %v1663_v11 = vrot.slane %v3693_v61, 1  ;;  %v1986_v53 = vrot.slane %v3693_v61, 2  ;;  %v1866_v48 = vadd.f32 %v1716_v52, %v3417_v37 }
 0x1ba   : > { %v906_v3 = vadd.f32 %v850_v1, %v748_v32  ;;  %478 = vst.msk [vmem:[#allocation2 + $0x110] sm:$0xff] %vm443_vm0, %v377_v56 }
 0x1bb   : > { %v1334_v15 = vld [vmem:[#allocation2 + $0x100] sm:$0xff]  ;;  %v751_v54 = vpop.f32.mrf.mxu1  ;;  %v1664_v46 = vsel %vm1582_vm2, %v1661_v33, %v1663_v11  ;;  %v1987_v62 = vsel %vm1905_vm1, %v1984_v14, %v1986_v53 }
 0x1bc   : > { %962 = vst.msk [vmem:[#allocation2 + $0x108] sm:$0xff] %vm443_vm0, %v906_v3  ;;  %v1390_v51 = vadd.f32 %v1334_v15, %v1230_v10  ;;  %v1233_v29 = vpop.f32.mrf.mxu2 }
 0x1bd   : > { %v3718_v30 = vld [vmem:[#allocation2 + $0xf8] sm:$0xff] }
 0x1be   : > { %1446 = vst.msk [vmem:[#allocation2 + $0x100] sm:$0xff] %vm443_vm0, %v1390_v51  ;;  %v1278_v58 = vpop.f32.mrf.mxu3  ;;  %v1960_v6 = vrot.slane %v3718_v30, 2  ;;  %v2041_v51 = vpop.permute.xlu2 %2040 }
 0x1bf   : > { %v1406_v12 = vadd.f32 %v1350_v34, %v1278_v58 }
 0x1c0   : > { %1739 = vrot.lane.b32.xlu2 %v1636_v40, %s2565_s7  ;;  %v380_v20 = vpop.f32.mrf.mxu0  ;;  %v3737_v3 = vld [vmem:[#allocation2 + $0x178] sm:$0xff]  ;;  %v1961_v58 = vsel %vm1905_vm1, %v1958_v43, %v1960_v6 }
 0x1c1   : > { %1462 = vst.msk [vmem:[#allocation2 + $0x180] sm:$0xff] %vm443_vm0, %v1406_v12  ;;  %v851_v44 = vld [vmem:[#allocation2 + $0x110] sm:$0xff]  ;;  %1771 = vrot.lane.b32.xlu0 %v1664_v46, %s2565_s7  ;;  %2062 = vrot.lane.b32.xlu1 %v1959_v0, %s2564_s6  ;;  %v1988_v34 = vrot.slane %v3737_v3, 2 }
 0x1c2   : > { %v907_v26 = vadd.f32 %v851_v44, %v751_v54  ;;  %479 = vst.msk [vmem:[#allocation2 + $0x118] sm:$0xff] %vm443_vm0, %v380_v20 }
 0x1c3   : > { %v1335_v28 = vld [vmem:[#allocation2 + $0x108] sm:$0xff]  ;;  %v1714_v23 = vpop.permute.xlu1 %1713  ;;  %v754_v33 = vpop.f32.mrf.mxu1 }
 0x1c4   : > { %963 = vst.msk [vmem:[#allocation2 + $0x110] sm:$0xff] %vm443_vm0, %v907_v26  ;;  %v1391_v25 = vadd.f32 %v1335_v28, %v1233_v29  ;;  %v1865_v16 = vadd.f32 %v1714_v23, %v3414_v22  ;;  %v2037_v21 = vpop.permute.xlu0 %2036  ;;  %v1236_v32 = vpop.f32.mrf.mxu2  ;;  %v1637_v22 = vrot.slane %v3718_v30, 1  ;;  %v1352_v29 = vld [vmem:[#allocation2 + $0x190] sm:$0xff]  ;;  %v1665_v28 = vrot.slane %v3737_v3, 1 }
 0x1c6   : > { %1447 = vst.msk [vmem:[#allocation2 + $0x108] sm:$0xff] %vm443_vm0, %v1391_v25  ;;  %v2188_v49 = vadd.f32 %v2037_v21, %v1865_v16  ;;  %v1281_v10 = vpop.f32.mrf.mxu3  ;;  %v1638_v12 = vsel %vm1582_vm2, %v1635_v19, %v1637_v22  ;;  %v1353_v21 = vld [vmem:[#allocation2 + $0x198] sm:$0xff] }
 0x1c7   : > { %v1407_v47 = vadd.f32 %v1351_v27, %v1281_v10  ;;  %v3765_v27 = vld [vmem:[#allocation2 + $0x100] sm:$0xff] }
 0x1c8   : > { %2246 = vst.msk [vmem:[%s3393_s13 + $0x80] sm:$0xff] %vm2228_vm3, %v2188_v49  ;;  %2094 = vrot.lane.b32.xlu2 %v1987_v62, %s2564_s6  ;;  %v383_v39 = vpop.f32.mrf.mxu0  ;;  %v1666_v49 = vsel %vm1582_vm2, %v1663_v11, %v1665_v28 }
 0x1c9   : > { %1463 = vst.msk [vmem:[#allocation2 + $0x188] sm:$0xff] %vm443_vm0, %v1407_v47  ;;  %v852_v45 = vld [vmem:[#allocation2 + $0x118] sm:$0xff]  ;;  %2066 = vrot.lane.b32.xlu0 %v1960_v6, %s2564_s6  ;;  %1743 = vrot.lane.b32.xlu1 %v1637_v22, %s2565_s7 }
 0x1ca   : > { %v908_v14 = vadd.f32 %v852_v45, %v754_v33  ;;  %480 = vst.msk [vmem:[#allocation2 + $0x120] sm:$0xff] %vm443_vm0, %v383_v39 }
 0x1cb   : > { %v1336_v36 = vld [vmem:[#allocation2 + $0x110] sm:$0xff]  ;;  %v2039_v24 = vpop.permute.xlu1 %2038  ;;  %v757_v1 = vpop.f32.mrf.mxu1 }
 0x1cc   : > { %964 = vst.msk [vmem:[#allocation2 + $0x118] sm:$0xff] %vm443_vm0, %v908_v14  ;;  %v1392_v7 = vadd.f32 %v1336_v36, %v1236_v32  ;;  %v2189_v56 = vadd.f32 %v2039_v24, %v1866_v48  ;;  %v1239_v15 = vpop.f32.mrf.mxu2  ;;  %v1722_v25 = vpop.permute.xlu2 %1721  ;;  %v3777_v48 = vld [vmem:[#allocation2 + $0x180] sm:$0xff]  ;;  %v1962_v14 = vrot.slane %v3765_v27, 2 }
 0x1cd   : > { %v3767_v47 = vld [vmem:[#allocation2 + $0x108] sm:$0xff] }
 0x1ce   : > { %1448 = vst.msk [vmem:[#allocation2 + $0x110] sm:$0xff] %vm443_vm0, %v1392_v7  ;;  %v1284_v54 = vpop.f32.mrf.mxu3  ;;  %v1640_v45 = vrot.slane %v3767_v47, 1 }
 0x1cf   : > { %2247 = vst.msk [vmem:[%s3393_s13 + $0x88] sm:$0xff] %vm2228_vm3, %v2189_v56  ;;  %v1408_v37 = vadd.f32 %v1352_v29, %v1284_v54 }
 0x1d0   : > { %2064 = vrot.lane.b32.xlu2 %v1961_v58, %s2564_s6  ;;  %v386_v40 = vpop.f32.mrf.mxu0  ;;  %v3772_v6 = vld [vmem:[#allocation2 + $0x188] sm:$0xff]  ;;  %v1667_v58 = vrot.slane %v3777_v48, 1 }
 0x1d1   : > { %1464 = vst.msk [vmem:[#allocation2 + $0x190] sm:$0xff] %vm443_vm0, %v1408_v37  ;;  %v853_v46 = vld [vmem:[#allocation2 + $0x120] sm:$0xff]  ;;  %2098 = vrot.lane.b32.xlu1 %v1988_v34, %s2564_s6  ;;  %1741 = vrot.lane.b32.xlu0 %v1638_v12, %s2565_s7  ;;  %v1668_v56 = vrot.slane %v3772_v6, 1 }
 0x1d2   : > { %v909_v0 = vadd.f32 %v853_v46, %v757_v1  ;;  %481 = vst.msk [vmem:[#allocation2 + $0x128] sm:$0xff] %vm443_vm0, %v386_v40  ;;  %v1963_v1 = vrot.slane %v3767_v47, 2  ;;  %v1354_v37 = vld [vmem:[#allocation2 + $0x1a0] sm:$0xff] }
 0x1d3   : > { %v2043_v43 = vpop.permute.xlu0 %2042  ;;  %v1337_v20 = vld [vmem:[#allocation2 + $0x118] sm:$0xff]  ;;  %v1720_v44 = vpop.permute.xlu1 %1719 }
 0x1d4   : > { %965 = vst.msk [vmem:[#allocation2 + $0x120] sm:$0xff] %vm443_vm0, %v909_v0  ;;  %v1393_v26 = vadd.f32 %v1337_v20, %v1239_v15  ;;  %v1868_v19 = vadd.f32 %v1720_v44, %v3472_v13  ;;  %v760_v23 = vpop.f32.mrf.mxu1  ;;  %v1989_v13 = vsel %vm1905_vm1, %v1986_v53, %v1988_v34  ;;  %v1639_v53 = vrot.slane %v3765_v27, 1  ;;  %v2047_v40 = vpop.permute.xlu2 %2046 }
 0x1d5   : > { %v1242_v52 = vpop.f32.mrf.mxu2  ;;  %v3799_v20 = vld [vmem:[#allocation2 + $0x110] sm:$0xff]  ;;  %v1869_v44 = vadd.f32 %v1722_v25, %v3504_v50 }
 0x1d6   : > { %1449 = vst.msk [vmem:[#allocation2 + $0x118] sm:$0xff] %vm443_vm0, %v1393_v26  ;;  %v2191_v16 = vadd.f32 %v2043_v43, %v1868_v19  ;;  %v1287_v33 = vpop.f32.mrf.mxu3  ;;  %v1641_v12 = vsel %vm1582_vm2, %v1639_v53, %v1640_v45 }
 0x1d7   : > { %v1409_v32 = vadd.f32 %v1353_v21, %v1287_v33 }
 0x1d8   : > { %2249 = vst.msk [vmem:[%s3393_s13 + $0x98] sm:$0xf] %vm2232_vm4, %v2191_v16  ;;  %1775 = vrot.lane.b32.xlu2 %v1665_v28, %s2565_s7  ;;  %v389_v10 = vpop.f32.mrf.mxu0  ;;  %v3797_v43 = vld [vmem:[#allocation2 + $0x190] sm:$0xff] }
 0x1d9   : > { %1465 = vst.msk [vmem:[#allocation2 + $0x198] sm:$0xff] %vm443_vm0, %v1409_v32  ;;  %v854_v62 = vld [vmem:[#allocation2 + $0x128] sm:$0xff]  ;;  %1773 = vrot.lane.b32.xlu1 %v1666_v49, %s2565_s7  ;;  %2096 = vrot.lane.b32.xlu0 %v1989_v13, %s2564_s6  ;;  %v1670_v21 = vrot.slane %v3797_v43, 1  ;;  %v1642_v32 = vrot.slane %v3799_v20, 1  ;;  %v1990_v49 = vrot.slane %v3777_v48, 2 }
 0x1da   : > { %v910_v22 = vadd.f32 %v854_v62, %v760_v23  ;;  %482 = vst.msk [vmem:[#allocation2 + $0x130] sm:$0xff] %vm443_vm0, %v389_v10  ;;  %v1991_v23 = vrot.slane %v3772_v6, 2  ;;  %v1355_v13 = vld [vmem:[#allocation2 + $0x1a8] sm:$0xff] }
 0x1db   : > { %v1718_v11 = vpop.permute.xlu0 %1717  ;;  %v1338_v39 = vld [vmem:[#allocation2 + $0x120] sm:$0xff] }
 0x1dc   : > { %966 = vst.msk [vmem:[#allocation2 + $0x128] sm:$0xff] %vm443_vm0, %v910_v22  ;;  %v1867_v36 = vadd.f32 %v1718_v11, %v3446_v2  ;;  %v1394_v24 = vadd.f32 %v1338_v39, %v1242_v52  ;;  %v763_v7 = vpop.f32.mrf.mxu1  ;;  %v1669_v2 = vsel %vm1582_vm2, %v1667_v58, %v1668_v56  ;;  %v1992_v62 = vsel %vm1905_vm1, %v1990_v49, %v1991_v23  ;;  %v1357_v49 = vld [vmem:[#allocation2 + $0x1b8] sm:$0xff] }
 0x1dd   : > { %v1245_v15 = vpop.f32.mrf.mxu2  ;;  %v1671_v22 = vsel %vm1582_vm2, %v1668_v56, %v1670_v21  ;;  %v1643_v11 = vsel %vm1582_vm2, %v1640_v45, %v1642_v32  ;;  %v1965_v56 = vrot.slane %v3799_v20, 2 }
 0x1de   : > { %v2190_v54 = vadd.f32 %v2041_v51, %v1867_v36  ;;  %1450 = vst.msk [vmem:[#allocation2 + $0x120] sm:$0xff] %vm443_vm0, %v1394_v24  ;;  %v1290_v29 = vpop.f32.mrf.mxu3  ;;  %v1964_v51 = vsel %vm1905_vm1, %v1962_v14, %v1963_v1  ;;  %v1728_v14 = vpop.permute.xlu2 %1727 }
 0x1df   : > { %v1410_v34 = vadd.f32 %v1354_v37, %v1290_v29  ;;  %v3827_v29 = vld [vmem:[#allocation2 + $0x118] sm:$0xff] }
 0x1e0   : > { %2248 = vst.msk [vmem:[%s3393_s13 + $0x90] sm:$0xff] %vm2228_vm3, %v2190_v54  ;;  %1745 = vrot.lane.b32.xlu2 %v1641_v12, %s2565_s7  ;;  %v392_v46 = vpop.f32.mrf.mxu0  ;;  %v1993_v54 = vrot.slane %v3797_v43, 2 }
 0x1e1   : > { %1466 = vst.msk [vmem:[#allocation2 + $0x1a0] sm:$0xff] %vm443_vm0, %v1410_v34  ;;  %v855_v0 = vld [vmem:[#allocation2 + $0x130] sm:$0xff]  ;;  %1777 = vrot.lane.b32.xlu0 %v1669_v2, %s2565_s7  ;;  %2068 = vrot.lane.b32.xlu1 %v1964_v51, %s2564_s6 }
 0x1e2   : > { %v911_v26 = vadd.f32 %v855_v0, %v763_v7  ;;  %483 = vst.msk [vmem:[#allocation2 + $0x138] sm:$0xff] %vm443_vm0, %v392_v46  ;;  %v1356_v2 = vld [vmem:[#allocation2 + $0x1b0] sm:$0xff]  ;;  %v1966_v46 = vsel %vm1905_vm1, %v1963_v1, %v1965_v56  ;;  %v1967_v0 = vrot.slane %v3827_v29, 2 }
 0x1e3   : > { %v1339_v19 = vld [vmem:[#allocation2 + $0x128] sm:$0xff]  ;;  %v2045_v28 = vpop.permute.xlu1 %2044 }
 0x1e4   : > { %967 = vst.msk [vmem:[#allocation2 + $0x130] sm:$0xff] %vm443_vm0, %v911_v26  ;;  %v1395_v52 = vadd.f32 %v1339_v19, %v1245_v15  ;;  %v2192_v16 = vadd.f32 %v2045_v28, %v1869_v44  ;;  %v766_v33 = vpop.f32.mrf.mxu1  ;;  %v1872_v26 = vadd.f32 %v1728_v14, %v3546_v17 }
 0x1e5   : > { %v1248_v50 = vpop.f32.mrf.mxu2 }
 0x1e6   : > { %1451 = vst.msk [vmem:[#allocation2 + $0x128] sm:$0xff] %vm443_vm0, %v1395_v52  ;;  %v1293_v25 = vpop.f32.mrf.mxu3 }
 0x1e7   : > { %2250 = vst.msk [vmem:[%s3393_s13 + $0xa0] sm:$0xff] %vm2228_vm3, %v2192_v16  ;;  %v1411_v10 = vadd.f32 %v1355_v13, %v1293_v25 }
 0x1e8   : > { %2100 = vrot.lane.b32.xlu2 %v1992_v62, %s2564_s6  ;;  %v395_v39 = vpop.f32.mrf.mxu0 }
 0x1e9   : > { %1467 = vst.msk [vmem:[#allocation2 + $0x1a8] sm:$0xff] %vm443_vm0, %v1411_v10  ;;  %v856_v53 = vld [vmem:[#allocation2 + $0x138] sm:$0xff]  ;;  %1779 = vrot.lane.b32.xlu1 %v1671_v22, %s2565_s7  ;;  %1747 = vrot.lane.b32.xlu0 %v1643_v11, %s2565_s7  ;;  %v1968_v10 = vsel %vm1905_vm1, %v1965_v56, %v1967_v0 }
 0x1ea   : > { %v912_v36 = vadd.f32 %v856_v53, %v766_v33  ;;  %484 = vst.msk [vmem:[#allocation2 + $0x140] sm:$0xff] %vm443_vm0, %v395_v39  ;;  %v1644_v33 = vrot.slane %v3827_v29, 1  ;;  %v3856_v11 = vld [vmem:[#allocation2 + $0x198] sm:$0xff] }
 0x1eb   : > { %v1340_v24 = vld [vmem:[#allocation2 + $0x130] sm:$0xff]  ;;  %v1724_v7 = vpop.permute.xlu0 %1723  ;;  %v2053_v1 = vpop.permute.xlu2 %2052  ;;  %v1995_v56 = vrot.slane %v3856_v11, 2 }
 0x1ec   : > { %968 = vst.msk [vmem:[#allocation2 + $0x138] sm:$0xff] %vm443_vm0, %v912_v36  ;;  %v1396_v45 = vadd.f32 %v1340_v24, %v1248_v50  ;;  %v1870_v15 = vadd.f32 %v1724_v7, %v3510_v59  ;;  %v769_v37 = vpop.f32.mrf.mxu1  ;;  %v1994_v59 = vsel %vm1905_vm1, %v1991_v23, %v1993_v54  ;;  %v1645_v62 = vsel %vm1582_vm2, %v1642_v32, %v1644_v33 }
 0x1ed   : > { %v1251_v58 = vpop.f32.mrf.mxu2 }
 0x1ee   : > { %1452 = vst.msk [vmem:[#allocation2 + $0x130] sm:$0xff] %vm443_vm0, %v1396_v45  ;;  %v2193_v34 = vadd.f32 %v2047_v40, %v1870_v15  ;;  %v1296_v12 = vpop.f32.mrf.mxu3  ;;  %v1672_v15 = vrot.slane %v3856_v11, 1 }
 0x1ef   : > { %v1412_v51 = vadd.f32 %v1356_v2, %v1296_v12  ;;  %v3875_v12 = vld [vmem:[#allocation2 + $0x128] sm:$0xff] }
 0x1f0   : > { %2251 = vst.msk [vmem:[%s3393_s13 + $0xa8] sm:$0xff] %vm2228_vm3, %v2193_v34  ;;  %2070 = vrot.lane.b32.xlu2 %v1966_v46, %s2564_s6  ;;  %v398_v44 = vpop.f32.mrf.mxu0  ;;  %v3873_v34 = vld [vmem:[#allocation2 + $0x1a8] sm:$0xff] }
 0x1f1   : > { %1468 = vst.msk [vmem:[#allocation2 + $0x1b0] sm:$0xff] %vm443_vm0, %v1412_v51  ;;  %v857_v40 = vld [vmem:[#allocation2 + $0x140] sm:$0xff]  ;;  %2102 = vrot.lane.b32.xlu0 %v1994_v59, %s2564_s6  ;;  %2074 = vrot.lane.b32.xlu1 %v1967_v0, %s2564_s6 }
 0x1f2   : > { %v913_v19 = vadd.f32 %v857_v40, %v769_v37  ;;  %485 = vst.msk [vmem:[#allocation2 + $0x148] sm:$0xff] %vm443_vm0, %v398_v44  ;;  %v2051_v28 = vpop.permute.xlu1 %2050  ;;  %v1996_v37 = vsel %vm1905_vm1, %v1993_v54, %v1995_v56  ;;  %v3877_v0 = vld [vmem:[#allocation2 + $0x1a0] sm:$0xff]  ;;  %v1647_v40 = vrot.slane %v3875_v12, 1 }
 0x1f3   : > { %v2195_v52 = vadd.f32 %v2051_v28, %v1872_v26  ;;  %v1341_v16 = vld [vmem:[#allocation2 + $0x138] sm:$0xff]  ;;  %v2049_v36 = vpop.permute.xlu0 %2048  ;;  %v1675_v26 = vrot.slane %v3873_v34, 1  ;;  %v1674_v28 = vrot.slane %v3877_v0, 1 }
 0x1f4   : > { %969 = vst.msk [vmem:[#allocation2 + $0x140] sm:$0xff] %vm443_vm0, %v913_v19  ;;  %v1397_v23 = vadd.f32 %v1341_v16, %v1251_v58  ;;  %v772_v25 = vpop.f32.mrf.mxu1  ;;  %v3869_v58 = vld [vmem:[#allocation2 + $0x120] sm:$0xff] }
 0x1f5   : > { %2253 = vst.msk [vmem:[%s3393_s13 + $0xb8] sm:$0xf] %vm2232_vm4, %v2195_v52  ;;  %v1254_v13 = vpop.f32.mrf.mxu2  ;;  %v1646_v59 = vrot.slane %v3869_v58, 1  ;;  %v1673_v52 = vsel %vm1582_vm2, %v1670_v21, %v1672_v15  ;;  %v1676_v16 = vsel %vm1582_vm2, %v1674_v28, %v1675_v26  ;;  %v1969_v21 = vrot.slane %v3869_v58, 2 }
 0x1f6   : > { %1453 = vst.msk [vmem:[#allocation2 + $0x138] sm:$0xff] %vm443_vm0, %v1397_v23  ;;  %v1299_v17 = vpop.f32.mrf.mxu3 }
 0x1f7   : > { %v1413_v50 = vadd.f32 %v1357_v49, %v1299_v17  ;;  %v1970_v49 = vrot.slane %v3875_v12, 2 }
 0x1f8   : > { %1751 = vrot.lane.b32.xlu2 %v1644_v33, %s2565_s7 }
 0x1f9   : > { %1469 = vst.msk [vmem:[#allocation2 + $0x1b8] sm:$0xff] %vm443_vm0, %v1413_v50  ;;  %v858_v22 = vld [vmem:[#allocation2 + $0x148] sm:$0xff]  ;;  %2072 = vrot.lane.b32.xlu0 %v1968_v10, %s2564_s6  ;;  %1749 = vrot.lane.b32.xlu1 %v1645_v62, %s2565_s7  ;;  %v1997_v62 = vrot.slane %v3877_v0, 2 }
 0x1fa   : > { %v914_v39 = vadd.f32 %v858_v22, %v772_v25  ;;  %v1726_v53 = vpop.permute.xlu1 %1725  ;;  %v3858_v14 = vpop.permute.xlu2 %2058  ;;  %v1998_v25 = vrot.slane %v3873_v34, 2  ;;  %v1971_v22 = vsel %vm1905_vm1, %v1969_v21, %v1970_v49 }
 0x1fb   : > { %v1871_v24 = vadd.f32 %v1726_v53, %v3529_v38  ;;  %v1342_v7 = vld [vmem:[#allocation2 + $0x140] sm:$0xff]  ;;  %v3911_v53 = vld [vmem:[#allocation2 + $0x1b0] sm:$0xff] }
 0x1fc   : > { %970 = vst.msk [vmem:[#allocation2 + $0x148] sm:$0xff] %vm443_vm0, %v914_v39  ;;  %v1398_v32 = vadd.f32 %v1342_v7, %v1254_v13  ;;  %v1999_v39 = vsel %vm1905_vm1, %v1997_v62, %v1998_v25 }
 0x1fd   : > { %v2194_v45 = vadd.f32 %v2049_v36, %v1871_v24  ;;  %v1257_v38 = vpop.f32.mrf.mxu2  ;;  %v3915_v36 = vld [vmem:[#allocation2 + $0x138] sm:$0xff] }
 0x1fe   : > { %1454 = vst.msk [vmem:[#allocation2 + $0x140] sm:$0xff] %vm443_vm0, %v1398_v32  ;;  %v1651_v28 = vrot.slane %v3915_v36, 1 }
 0x1ff   : > { %2252 = vst.msk [vmem:[%s3393_s13 + $0xb0] sm:$0xff] %vm2228_vm3, %v2194_v45  ;;  %v1677_v45 = vrot.slane %v3911_v53, 1 }
 0x200   : > { %2106 = vrot.lane.b32.xlu2 %v1995_v56, %s2564_s6 }
 0x201   : > { %1783 = vrot.lane.b32.xlu0 %v1672_v15, %s2565_s7  ;;  %2104 = vrot.lane.b32.xlu1 %v1996_v37, %s2564_s6 }
 0x202   : > { %v1734_v2 = vpop.permute.xlu2 %1733 }
 0x203   : > { %v1343_v51 = vld [vmem:[#allocation2 + $0x148] sm:$0xff]  ;;  %v1730_v46 = vpop.permute.xlu0 %1729  ;;  %v1875_v24 = vadd.f32 %v1734_v2, %v3591_v60 }
 0x204   : > { %v1399_v54 = vadd.f32 %v1343_v51, %v1257_v38  ;;  %v1873_v44 = vadd.f32 %v1730_v46, %v3569_v31  ;;  %v1648_v31 = vsel %vm1582_vm2, %v1646_v59, %v1647_v40  ;;  %v1974_v51 = vrot.slane %v3915_v36, 2 }
 0x205   : > { %v1678_v59 = vsel %vm1582_vm2, %v1675_v26, %v1677_v45 }
 0x206   : > { %1455 = vst.msk [vmem:[#allocation2 + $0x148] sm:$0xff] %vm443_vm0, %v1399_v54  ;;  %v2196_v19 = vadd.f32 %v2053_v1, %v1873_v44  ;;  %v3895_v1 = vld [vmem:[#allocation2 + $0x130] sm:$0xff] }
 0x207   : > { %v1649_v13 = vrot.slane %v3895_v1, 1  ;;  %v1972_v38 = vrot.slane %v3895_v1, 2 }
 0x208   : > { %2254 = vst.msk [vmem:[%s3393_s13 + $0xc0] sm:$0xff] %vm2228_vm3, %v2196_v19  ;;  %1781 = vrot.lane.b32.xlu2 %v1673_v52, %s2565_s7  ;;  %v3943_v52 = vld [vmem:[#allocation2 + $0x140] sm:$0xff] }
 0x209   : > { %1785 = vrot.lane.b32.xlu1 %v1676_v16, %s2565_s7  ;;  %1753 = vrot.lane.b32.xlu0 %v1648_v31, %s2565_s7  ;;  %v1973_v60 = vsel %vm1905_vm1, %v1970_v49, %v1972_v38  ;;  %v1975_v2 = vsel %vm1905_vm1, %v1972_v38, %v1974_v51  ;;  %v1653_v21 = vrot.slane %v3943_v52, 1 }
 0x20a   : > { %v2089_v23 = vpop.permute.xlu2 %2088 }
 0x20b   : > { %v2055_v33 = vpop.permute.xlu0 %2054  ;;  %v1732_v17 = vpop.permute.xlu1 %1731 }
 0x20c   : > { %v1874_v50 = vadd.f32 %v1732_v17, %v3572_v35  ;;  %v1650_v35 = vsel %vm1582_vm2, %v1647_v40, %v1649_v13  ;;  %v3934_v40 = vld [vmem:[#allocation2 + $0x1b8] sm:$0xff] }
 0x20d   : > { %v1679_v19 = vrot.slane %v3934_v40, 1 }
 0x20e   : > { %v2197_v10 = vadd.f32 %v2055_v33, %v1874_v50  ;;  %v3945_v33 = vld [vmem:[#allocation2 + $0x148] sm:$0xff] }
 0x20f   : > { %v1654_v50 = vrot.slane %v3945_v33, 1  ;;  %v1680_v62 = vsel %vm1582_vm2, %v1677_v45, %v1679_v19 }
 0x210   : > { %2255 = vst.msk [vmem:[%s3393_s13 + $0xc8] sm:$0xff] %vm2228_vm3, %v2197_v10  ;;  %2076 = vrot.lane.b32.xlu2 %v1971_v22, %s2564_s6  ;;  %v1652_v10 = vsel %vm1582_vm2, %v1649_v13, %v1651_v28 }
 0x211   : > { %2108 = vrot.lane.b32.xlu0 %v1999_v39, %s2564_s6  ;;  %1755 = vrot.lane.b32.xlu1 %v1650_v35, %s2565_s7  ;;  %v1655_v22 = vsel %vm1582_vm2, %v1653_v21, %v1654_v50 }
 0x212   : > { %v1770_v7 = vpop.permute.xlu2 %1769 }
 0x213   : > { %v2057_v32 = vpop.permute.xlu1 %2056  ;;  %v1736_v56 = vpop.permute.xlu0 %1735 }
 0x214   : > { %v2198_v15 = vadd.f32 %v2057_v32, %v1875_v24  ;;  %v1876_v37 = vadd.f32 %v1736_v56, %v3604_v9 }
 0x216   : > { %2256 = vst.msk [vmem:[%s3393_s13 + $0xd0] sm:$0xff] %vm2228_vm3, %v2198_v15  ;;  %v2199_v46 = vadd.f32 %v3858_v14, %v1876_v37  ;;  %v1976_v15 = vrot.slane %v3943_v52, 2  ;;  %v1977_v37 = vrot.slane %v3945_v33, 2 }
 0x218   : > { %2257 = vst.msk [vmem:[%s3393_s13 + $0xd8] sm:$0xf] %vm2232_vm4, %v2199_v46  ;;  %1787 = vrot.lane.b32.xlu2 %v1678_v59, %s2565_s7 }
 0x219   : > { %2078 = vrot.lane.b32.xlu0 %v1973_v60, %s2564_s6  ;;  %2080 = vrot.lane.b32.xlu1 %v1975_v2, %s2564_s6  ;;  %v2000_v2 = vrot.slane %v3911_v53, 2 }
 0x21a   : > { %v1740_v9 = vpop.permute.xlu2 %1739 }
 0x21b   : > { %v1768_v54 = vpop.permute.xlu1 %1767  ;;  %v2091_v44 = vpop.permute.xlu0 %2090  ;;  %v1878_v45 = vadd.f32 %v1740_v9, %v3641_v55  ;;  %v2001_v55 = vsel %vm1905_vm1, %v1998_v25, %v2000_v2 }
 0x21c   : > { %v1892_v14 = vadd.f32 %v1768_v54, %v3619_v8 }
 0x21e   : > { %v2215_v26 = vadd.f32 %v2091_v44, %v1892_v14 }
 0x220   : > { %2273 = vst.msk [vmem:[%s3393_s13 + $0x158] sm:$0xf] %vm2232_vm4, %v2215_v26  ;;  %2082 = vrot.lane.b32.xlu2 %v1974_v51, %s2564_s6 }
 0x221   : > { %1791 = vrot.lane.b32.xlu1 %v1679_v19, %s2565_s7  ;;  %1759 = vrot.lane.b32.xlu0 %v1651_v28, %s2565_s7 }
 0x222   : > { %v2095_v16 = vpop.permute.xlu2 %2094 }
 0x223   : > { %v1766_v8 = vpop.permute.xlu0 %1765  ;;  %v1738_v31 = vpop.permute.xlu1 %1737 }
 0x224   : > { %v1891_v17 = vadd.f32 %v1766_v8, %v3634_v57  ;;  %v1877_v39 = vadd.f32 %v1738_v31, %v3637_v63  ;;  %v1978_v63 = vsel %vm1905_vm1, %v1976_v15, %v1977_v37 }
 0x226   : > { %v2214_v49 = vadd.f32 %v2089_v23, %v1891_v17  ;;  %v1893_v23 = vadd.f32 %v1770_v7, %v3666_v42  ;;  %v1657_v42 = vsel %vm1582_vm2, %v1654_v50, %v1656_v41  ;;  %v1980_v7 = vsel %vm1905_vm1, %v1977_v37, %v1979_v5 }
 0x227   : > { %v2002_v41 = vrot.slane %v3934_v40, 2 }
 0x228   : > { %2272 = vst.msk [vmem:[%s3393_s13 + $0x150] sm:$0xff] %vm2228_vm3, %v2214_v49  ;;  %1757 = vrot.lane.b32.xlu2 %v1652_v10, %s2565_s7 }
 0x229   : > { %1789 = vrot.lane.b32.xlu0 %v1680_v62, %s2565_s7  ;;  %1761 = vrot.lane.b32.xlu1 %v1655_v22, %s2565_s7  ;;  %v2003_v5 = vsel %vm1905_vm1, %v2000_v2, %v2002_v41 }
 0x22a   : > { %v2065_v35 = vpop.permute.xlu2 %2064 }
 0x22b   : > { %v2061_v13 = vpop.permute.xlu0 %2060  ;;  %v2093_v24 = vpop.permute.xlu1 %2092 }
 0x22c   : > { %v2200_v32 = vadd.f32 %v2061_v13, %v1877_v39  ;;  %v2216_v56 = vadd.f32 %v2093_v24, %v1893_v23 }
 0x22e   : > { %2258 = vst.msk [vmem:[%s3393_s13 + $0xe0] sm:$0xff] %vm2228_vm3, %v2200_v32 }
 0x22f   : > { %2274 = vst.msk [vmem:[%s3393_s13 + $0x160] sm:$0xff] %vm2228_vm3, %v2216_v56 }
 0x230   : > { %1763 = vrot.lane.b32.xlu2 %v1657_v42, %s2565_s7 }
 0x231   : > { %2084 = vrot.lane.b32.xlu0 %v1978_v63, %s2564_s6  ;;  %2086 = vrot.lane.b32.xlu1 %v1980_v7, %s2564_s6 }
 0x232   : > { %v1776_v38 = vpop.permute.xlu2 %1775 }
 0x233   : > { %v1772_v51 = vpop.permute.xlu0 %1771  ;;  %v2063_v46 = vpop.permute.xlu1 %2062  ;;  %v1896_v26 = vadd.f32 %v1776_v38, %v3737_v3 }
 0x234   : > { %v1894_v59 = vadd.f32 %v1772_v51, %v3659_v4  ;;  %v2201_v60 = vadd.f32 %v2063_v46, %v1878_v45 }
 0x236   : > { %v2217_v57 = vadd.f32 %v2095_v16, %v1894_v59  ;;  %2259 = vst.msk [vmem:[%s3393_s13 + $0xe8] sm:$0xff] %vm2228_vm3, %v2201_v60 }
 0x238   : > { %2275 = vst.msk [vmem:[%s3393_s13 + $0x168] sm:$0xff] %vm2228_vm3, %v2217_v57  ;;  %2112 = vrot.lane.b32.xlu2 %v2003_v5, %s2564_s6 }
 0x239   : > { %2114 = vrot.lane.b32.xlu0 %v2002_v41, %s2564_s6  ;;  %2110 = vrot.lane.b32.xlu1 %v2001_v55, %s2564_s6 }
 0x23a   : > { %v1746_v4 = vpop.permute.xlu2 %1745 }
 0x23b   : > { %v2067_v9 = vpop.permute.xlu0 %2066  ;;  %v1744_v54 = vpop.permute.xlu1 %1743  ;;  %v1881_v3 = vadd.f32 %v1746_v4, %v3765_v27 }
 0x23c   : > { %v1880_v44 = vadd.f32 %v1744_v54, %v3718_v30 }
 0x23e   : > { %v2203_v14 = vadd.f32 %v2067_v9, %v1880_v44 }
 0x240   : > { %2261 = vst.msk [vmem:[%s3393_s13 + $0xf8] sm:$0xf] %vm2232_vm4, %v2203_v14 }
 0x242   : > { %v2101_v19 = vpop.permute.xlu2 %2100 }
 0x243   : > { %v2099_v28 = vpop.permute.xlu1 %2098  ;;  %v1742_v16 = vpop.permute.xlu0 %1741 }
 0x244   : > { %v2219_v25 = vadd.f32 %v2099_v28, %v1896_v26  ;;  %v1879_v8 = vadd.f32 %v1742_v16, %v3688_v18 }
 0x246   : > { %2277 = vst.msk [vmem:[%s3393_s13 + $0x178] sm:$0xf] %vm2232_vm4, %v2219_v25  ;;  %v2202_v31 = vadd.f32 %v2065_v35, %v1879_v8 }
 0x248   : > { %2260 = vst.msk [vmem:[%s3393_s13 + $0xf0] sm:$0xff] %vm2228_vm3, %v2202_v31 }
 0x24a   : > { %v2071_v30 = vpop.permute.xlu2 %2070 }
 0x24b   : > { %v1774_v17 = vpop.permute.xlu1 %1773  ;;  %v2097_v21 = vpop.permute.xlu0 %2096 }
 0x24c   : > { %v1895_v49 = vadd.f32 %v1774_v17, %v3693_v61 }
 0x24e   : > { %v2218_v50 = vadd.f32 %v2097_v21, %v1895_v49 }
 0x250   : > { %2276 = vst.msk [vmem:[%s3393_s13 + $0x170] sm:$0xff] %vm2228_vm3, %v2218_v50 }
 0x252   : > { %v1752_v10 = vpop.permute.xlu2 %1751 }
 0x253   : > { %v1778_v18 = vpop.permute.xlu0 %1777  ;;  %v2069_v62 = vpop.permute.xlu1 %2068  ;;  %v1884_v27 = vadd.f32 %v1752_v10, %v3827_v29 }
 0x254   : > { %v1897_v22 = vadd.f32 %v1778_v18, %v3777_v48  ;;  %v2204_v23 = vadd.f32 %v2069_v62, %v1881_v3 }
 0x256   : > { %v2220_v39 = vadd.f32 %v2101_v19, %v1897_v22  ;;  %2262 = vst.msk [vmem:[%s3393_s13 + $0x100] sm:$0xff] %vm2228_vm3, %v2204_v23 }
 0x258   : > { %2278 = vst.msk [vmem:[%s3393_s13 + $0x180] sm:$0xff] %vm2228_vm3, %v2220_v39 }
 0x25a   : > { %v2107_v61 = vpop.permute.xlu2 %2106 }
 0x25b   : > { %v1780_v35 = vpop.permute.xlu1 %1779  ;;  %v1748_v13 = vpop.permute.xlu0 %1747 }
 0x25c   : > { %v1882_v24 = vadd.f32 %v1748_v13, %v3767_v47  ;;  %v1898_v48 = vadd.f32 %v1780_v35, %v3772_v6 }
 0x25e   : > { %v2205_v32 = vadd.f32 %v2071_v30, %v1882_v24 }
 0x260   : > { %2263 = vst.msk [vmem:[%s3393_s13 + $0x108] sm:$0xff] %vm2228_vm3, %v2205_v32 }
 0x262   : > { %v1782_v56 = vpop.permute.xlu2 %1781 }
 0x263   : > { %v2103_v15 = vpop.permute.xlu0 %2102  ;;  %v2075_v37 = vpop.permute.xlu1 %2074  ;;  %v1899_v6 = vadd.f32 %v1782_v56, %v3797_v43 }
 0x264   : > { %v2221_v42 = vadd.f32 %v2103_v15, %v1898_v48  ;;  %v2207_v63 = vadd.f32 %v2075_v37, %v1884_v27 }
 0x266   : > { %2279 = vst.msk [vmem:[%s3393_s13 + $0x188] sm:$0xff] %vm2228_vm3, %v2221_v42 }
 0x267   : > { %2265 = vst.msk [vmem:[%s3393_s13 + $0x118] sm:$0xf] %vm2232_vm4, %v2207_v63 }
 0x26a   : > { %v2077_v47 = vpop.permute.xlu2 %2076 }
 0x26b   : > { %v2073_v7 = vpop.permute.xlu0 %2072  ;;  %v1750_v45 = vpop.permute.xlu1 %1749 }
 0x26c   : > { %v1883_v38 = vadd.f32 %v1750_v45, %v3799_v20 }
 0x26e   : > { %v2206_v51 = vadd.f32 %v2073_v7, %v1883_v38 }
 0x270   : > { %2264 = vst.msk [vmem:[%s3393_s13 + $0x110] sm:$0xff] %vm2228_vm3, %v2206_v51 }
 0x272   : > { %v1788_v29 = vpop.permute.xlu2 %1787 }
 0x273   : > { %v1784_v46 = vpop.permute.xlu0 %1783  ;;  %v2105_v41 = vpop.permute.xlu1 %2104 }
 0x274   : > { %v1900_v59 = vadd.f32 %v1784_v46, %v3856_v11  ;;  %v2222_v60 = vadd.f32 %v2105_v41, %v1899_v6 }
 0x276   : > { %v2223_v2 = vadd.f32 %v2107_v61, %v1900_v59  ;;  %2280 = vst.msk [vmem:[%s3393_s13 + $0x190] sm:$0xff] %vm2228_vm3, %v2222_v60 }
 0x278   : > { %2281 = vst.msk [vmem:[%s3393_s13 + $0x198] sm:$0xf] %vm2232_vm4, %v2223_v2 }
 0x27a   : > { %v2083_v55 = vpop.permute.xlu2 %2082 }
 0x27b   : > { %v1786_v57 = vpop.permute.xlu1 %1785  ;;  %v1754_v20 = vpop.permute.xlu0 %1753 }
 0x27c   : > { %v1885_v5 = vadd.f32 %v1754_v20, %v3869_v58  ;;  %v1901_v4 = vadd.f32 %v1786_v57, %v3877_v0 }
 0x27e   : > { %v2208_v43 = vadd.f32 %v2077_v47, %v1885_v5 }
 0x280   : > { %2266 = vst.msk [vmem:[%s3393_s13 + $0x120] sm:$0xff] %vm2228_vm3, %v2208_v43 }
 0x282   : > { %v1758_v44 = vpop.permute.xlu2 %1757 }
 0x283   : > { %v2109_v9 = vpop.permute.xlu0 %2108  ;;  %v1756_v11 = vpop.permute.xlu1 %1755  ;;  %v1887_v14 = vadd.f32 %v1758_v44, %v3895_v1 }
 0x284   : > { %v2224_v54 = vadd.f32 %v2109_v9, %v1901_v4  ;;  %v1886_v26 = vadd.f32 %v1756_v11, %v3875_v12 }
 0x286   : > { %2282 = vst.msk [vmem:[%s3393_s13 + $0x1a0] sm:$0xff] %vm2228_vm3, %v2224_v54 }
 0x28a   : > { %v1764_v0 = vpop.permute.xlu2 %1763 }
 0x28b   : > { %v2079_v58 = vpop.permute.xlu0 %2078  ;;  %v2081_v19 = vpop.permute.xlu1 %2080  ;;  %v1890_v50 = vadd.f32 %v1764_v0, %v3945_v33 }
 0x28c   : > { %v2209_v28 = vadd.f32 %v2079_v58, %v1886_v26  ;;  %v2210_v16 = vadd.f32 %v2081_v19, %v1887_v14 }
 0x28e   : > { %2267 = vst.msk [vmem:[%s3393_s13 + $0x128] sm:$0xff] %vm2228_vm3, %v2209_v28 }
 0x28f   : > { %2268 = vst.msk [vmem:[%s3393_s13 + $0x130] sm:$0xff] %vm2228_vm3, %v2210_v16 }
 0x292   : > { %v2113_v21 = vpop.permute.xlu2 %2112 }
 0x293   : > { %v1792_v25 = vpop.permute.xlu1 %1791  ;;  %v1760_v8 = vpop.permute.xlu0 %1759 }
 0x294   : > { %v1888_v31 = vadd.f32 %v1760_v8, %v3915_v36  ;;  %v1904_v22 = vadd.f32 %v1792_v25, %v3934_v40 }
 0x296   : > { %v2211_v30 = vadd.f32 %v2083_v55, %v1888_v31 }
 0x298   : > { %2269 = vst.msk [vmem:[%s3393_s13 + $0x138] sm:$0xf] %vm2232_vm4, %v2211_v30 }
 0x29b   : > { %v1790_v12 = vpop.permute.xlu0 %1789  ;;  %v1762_v1 = vpop.permute.xlu1 %1761 }
 0x29c   : > { %v1903_v17 = vadd.f32 %v1790_v12, %v3911_v53  ;;  %v1889_v3 = vadd.f32 %v1762_v1, %v3943_v52  ;;  %v1902_v53 = vadd.f32 %v1788_v29, %v3873_v34 }
 0x29e   : > { %v2226_v49 = vadd.f32 %v2113_v21, %v1903_v17 }
 0x2a0   : > { %2284 = vst.msk [vmem:[%s3393_s13 + $0x1b0] sm:$0xff] %vm2228_vm3, %v2226_v49 }
 0x2a3   : > { %v2085_v10 = vpop.permute.xlu0 %2084  ;;  %v2087_v36 = vpop.permute.xlu1 %2086 }
 0x2a4   : > { %v2212_v18 = vadd.f32 %v2085_v10, %v1889_v3  ;;  %v2213_v62 = vadd.f32 %v2087_v36, %v1890_v50 }
 0x2a6   : > { %2270 = vst.msk [vmem:[%s3393_s13 + $0x140] sm:$0xff] %vm2228_vm3, %v2212_v18 }
 0x2a7   : > { %2271 = vst.msk [vmem:[%s3393_s13 + $0x148] sm:$0xff] %vm2228_vm3, %v2213_v62 }
 0x2ab   : > { %v2115_v23 = vpop.permute.xlu0 %2114  ;;  %v2111_v39 = vpop.permute.xlu1 %2110 }
 0x2ac   : > { %v2227_v61 = vadd.f32 %v2115_v23, %v1904_v22  ;;  %v2225_v35 = vadd.f32 %v2111_v39, %v1902_v53 }
 0x2ae   : > { %2285 = vst.msk [vmem:[%s3393_s13 + $0x1b8] sm:$0xf] %vm2232_vm4, %v2227_v61 }
 0x2af   : > { %2283 = vst.msk [vmem:[%s3393_s13 + $0x1a8] sm:$0xff] %vm2228_vm3, %v2225_v35 }
 0x2b0 PF: > { %s12_s9 = sadd.s32 1, %s2562_s9  }
 0x2b1   : > { %p9_p4 = scmp.ge.s32.totalorder %s12_s9, 4  }
 0x2b3   :  { %11 = sbr.rel (!%p9_p4) target bundleno = 1 (0x1), region = 60 }

</bundles_post_ra>
